<compile_context>
chip_gen: v5e
topology: v5e:2x2
jax: 0.10.0
libtpu: 0.0.40
codegen_flags: <defaults>
</compile_context>

<pallas_src>
import functools

import numpy as np
import jax
import jax.numpy as jnp
from jax.experimental import pallas as pl
from jax.experimental.pallas import tpu as pltpu


# ----------------------------------------------------------------------------
# Pallas kernel: one grid step = `bt` batch elements, full (Np, Np) DFT tiles.
# ----------------------------------------------------------------------------
def _asp_kernel(xr_ref, xi_ref,                 # field re/im          [bt, N, N]  f32
                fr_ref, fi_ref, fs_ref, fd_ref,  # F, F_re+F_im, F_re-F_im  [Np, Np] (compute dtype)
                hr_ref, hi_ref,                  # H * (1/N^2)          [Np, Np]  f32
                or_ref, oi_ref,                  # output re/im         [bt, N, N]  f32
                *pad_scratch,                    # optional VMEM pads   2 x [Np, Np] f32
                n, bt, compute_dtype):
    padded = len(pad_scratch) == 2
    f32 = jnp.float32

    fr = fr_ref[...]
    fi = fi_ref[...]
    fs = fs_ref[...]
    fd = fd_ref[...]
    hr = hr_ref[...]
    hi = hi_ref[...]

    if padded:
        xr_pad, xi_pad = pad_scratch
        # Zero every step (not just program_id == 0): with a "parallel" batch
        # axis on v7x each TensorCore has its own scratch and may never see
        # step 0, so step-0-only init would leave garbage in the pad region.
        xr_pad[...] = jnp.zeros_like(xr_pad)
        xi_pad[...] = jnp.zeros_like(xi_pad)

    def c(v):
        # Data-dependent operands are cast right before the MXU; loop-invariant
        # operands (fr/fi/fs/fd) already arrive in the compute dtype.
        return v.astype(compute_dtype)

    for b in range(bt):  # static unroll over the per-step batch tile
        if padded:
            xr_pad[:n, :n] = xr_ref[b]
            xi_pad[:n, :n] = xi_ref[b]
            xr = xr_pad[...]
            xi = xi_pad[...]
        else:
            xr = xr_ref[b]
            xi = xi_ref[b]

        # ---- stage 1: T = F @ X          (Gauss 3-multiply complex matmul) ----
        p1 = jnp.dot(fr, c(xr), preferred_element_type=f32)
        p2 = jnp.dot(fi, c(xi), preferred_element_type=f32)
        p3 = jnp.dot(fs, c(xr + xi), preferred_element_type=f32)
        tr = p1 - p2
        ti = p3 - p1 - p2

        # ---- stage 2: Y = T @ F ----
        p1 = jnp.dot(c(tr), fr, preferred_element_type=f32)
        p2 = jnp.dot(c(ti), fi, preferred_element_type=f32)
        p3 = jnp.dot(c(tr + ti), fs, preferred_element_type=f32)
        yr = p1 - p2
        yi = p3 - p1 - p2

        # ---- elementwise transfer function (carries 1/N^2), f32 on the VPU ----
        zr = yr * hr - yi * hi
        zi = yr * hi + yi * hr

        # ---- stage 3: U = conj(F) @ Z    (conj via F_diff; p2 sign folded) ----
        p1 = jnp.dot(fr, c(zr), preferred_element_type=f32)
        q2 = jnp.dot(fi, c(zi), preferred_element_type=f32)
        p3 = jnp.dot(fd, c(zr + zi), preferred_element_type=f32)
        ur = p1 + q2
        ui = p3 - p1 + q2

        # ---- stage 4: O = U @ conj(F) ----
        p1 = jnp.dot(c(ur), fr, preferred_element_type=f32)
        q2 = jnp.dot(c(ui), fi, preferred_element_type=f32)
        p3 = jnp.dot(c(ur + ui), fd, preferred_element_type=f32)
        o_r = p1 + q2
        o_i = p3 - p1 + q2

        if padded:
            or_ref[b] = o_r[:n, :n].astype(or_ref.dtype)
            oi_ref[b] = o_i[:n, :n].astype(oi_ref.dtype)
        else:
            or_ref[b] = o_r.astype(or_ref.dtype)
            oi_ref[b] = o_i.astype(oi_ref.dtype)


# ----------------------------------------------------------------------------
# Module-equivalent wrapper (parameter setup in numpy/JAX, hot path in Pallas)
# ----------------------------------------------------------------------------
class AngularSpectrumPropagation:
    def __init__(self, layer_size, wavelength, pixel_size, distance,
                 compute_dtype=jnp.bfloat16, check_nan=False):
        self.layer_size = N = int(layer_size)
        self.compute_dtype = compute_dtype
        self.check_nan = check_nan
        # Lane-aligned padded DFT size (multiple of 128, hence also of 8).
        self.n_pad = Np = ((N + 127) // 128) * 128

        # --- transfer function H (same math as the PyTorch __init__) ---------
        k = 2.0 * np.pi / wavelength
        fx = np.fft.fftfreq(N, d=pixel_size)
        fy = np.fft.fftfreq(N, d=pixel_size)
        FX, FY = np.meshgrid(fx, fy, indexing="ij")
        kx = 2.0 * np.pi * FX
        ky = 2.0 * np.pi * FY
        # torch clamps kz^2 to >= 0 BEFORE the sqrt, so kz is always purely real
        # and the where(kz.imag != 0, ...) in the reference is a no-op.
        kz = np.sqrt(np.clip(k ** 2 - kx ** 2 - ky ** 2, 0.0, None))
        h_re = np.cos(kz * distance).astype(np.float32)
        h_im = np.sin(kz * distance).astype(np.float32)
        self.H = jnp.asarray((h_re + 1j * h_im).astype(np.complex64))
        print(f"AngularSpectrumPropagation: H shape=({N}, {N}), evanescent waves=0")

        # --- padded, pre-scaled kernel constants ------------------------------
        # 1/N^2 (ifft2 normalization) is folded into H; F is shipped directly in
        # the compute dtype together with F_sum / F_diff for the Gauss stages.
        scale = np.float32(1.0 / float(N * N))
        idx = np.arange(N)
        ang = -2.0 * np.pi * np.outer(idx, idx) / N
        f_re = np.cos(ang).astype(np.float32)
        f_im = np.sin(ang).astype(np.float32)

        def pad(m):
            out = np.zeros((Np, Np), np.float32)
            out[:N, :N] = m
            return out

        self.f_re = jnp.asarray(pad(f_re), dtype=compute_dtype)
        self.f_im = jnp.asarray(pad(f_im), dtype=compute_dtype)
        self.f_sum = jnp.asarray(pad(f_re + f_im), dtype=compute_dtype)
        self.f_diff = jnp.asarray(pad(f_re - f_im), dtype=compute_dtype)
        self.h_re = jnp.asarray(pad(h_re * scale), dtype=jnp.float32)
        self.h_im = jnp.asarray(pad(h_im * scale), dtype=jnp.float32)

    # ---------------------------------------------------------------- helpers
    def _batch_tile(self, B):
        """Batch elements per grid step (divisor of B)."""
        Np = self.n_pad
        if Np <= 256:
            target = 4
        elif Np <= 512:
            target = 2
        else:
            target = 1
        if B >= 2:
            # Keep >= 2 grid steps when possible so v7x's 2 TCs both get work.
            target = min(target, max(1, B // 2))
        target = max(1, min(target, B))
        bt = 1
        for d in range(1, target + 1):
            if B % d == 0:
                bt = d
        return bt

    def _vmem_limit(self, bt, const_bufs, field_bufs):
        N, Np = self.layer_size, self.n_pad
        cb = jnp.dtype(self.compute_dtype).itemsize
        const_bytes = (4 * cb + 2 * 4) * Np * Np * const_bufs        # F*4 + H*2
        io_bytes = bt * N * N * 4 * 2 * (field_bufs + 2)             # in + out bufs
        scratch_bytes = 2 * Np * Np * 4 if N != Np else 0            # pad scratch
        live_bytes = (10 * 4 + 6 * cb) * Np * Np                     # intermediates
        est = int((const_bytes + io_bytes + scratch_bytes + live_bytes) * 1.5)
        est += 4 << 20
        try:
            cap = int(pltpu.get_tpu_info().vmem_capacity_bytes)      # generation-aware
        except Exception:
            cap = 64 << 20                                           # safe on all gens
        hi = int(cap * 0.9)
        return max(min(est, hi), min(32 << 20, hi))

    def _launch(self, xr, xi, B, use_pipeline_modes):
        N, Np = self.layer_size, self.n_pad
        bt = self._batch_tile(B)
        steps = B // bt
        padded = (N != Np)

        const_kwargs = {}
        field_in_kwargs = {}
        const_bufs, field_bufs = 2, 2
        if use_pipeline_modes and hasattr(pl, "Buffered"):
            # Constants never change across the grid -> single buffer.
            const_kwargs = dict(pipeline_mode=pl.Buffered(1))
            const_bufs = 1
            if Np <= 256 and steps >= 2:
                # Small-Np regime is HBM/overhead bound: deepen input pipelining.
                field_in_kwargs = dict(pipeline_mode=pl.Buffered(3))
                field_bufs = 3

        field_in_spec = pl.BlockSpec((bt, N, N), lambda i: (i, 0, 0), **field_in_kwargs)
        field_out_spec = pl.BlockSpec((bt, N, N), lambda i: (i, 0, 0))
        const_spec = pl.BlockSpec((Np, Np), lambda i: (0, 0), **const_kwargs)

        scratch_shapes = ([pltpu.VMEM((Np, Np), jnp.float32)] * 2) if padded else []

        kernel = functools.partial(_asp_kernel, n=N, bt=bt,
                                   compute_dtype=self.compute_dtype)

        return pl.pallas_call(
            kernel,
            out_shape=(
                jax.ShapeDtypeStruct((B, N, N), jnp.float32),
                jax.ShapeDtypeStruct((B, N, N), jnp.float32),
            ),
            grid_spec=pltpu.PrefetchScalarGridSpec(
                num_scalar_prefetch=0,
                grid=(steps,),
                in_specs=[
                    field_in_spec, field_in_spec,              # field re / im
                    const_spec, const_spec,                    # F re / im
                    const_spec, const_spec,                    # F_sum / F_diff
                    const_spec, const_spec,                    # H re / im (pre-scaled)
                ],
                out_specs=[field_out_spec, field_out_spec],
                scratch_shapes=scratch_shapes),
            compiler_params=pltpu.CompilerParams(
                dimension_semantics=("parallel",),
                vmem_limit_bytes=self._vmem_limit(bt, const_bufs, field_bufs)),
        )(xr, xi, self.f_re, self.f_im, self.f_sum, self.f_diff,
          self.h_re, self.h_im)

    # ------------------------------------------------------------------ call
    def __call__(self, field):
        """field: complex64 array [B, N, N] -> complex64 array [B, N, N]."""
        B = field.shape[0]
        xr = jnp.real(field).astype(jnp.float32)
        xi = jnp.imag(field).astype(jnp.float32)

        try:
            out_re, out_im = self._launch(xr, xi, B, use_pipeline_modes=True)
        except Exception:
            # Fallback for JAX versions without BlockSpec(pipeline_mode=...).
            out_re, out_im = self._launch(xr, xi, B, use_pipeline_modes=False)

        output = jax.lax.complex(out_re, out_im)

        if self.check_nan:
            # Debug-only path mirroring the PyTorch raise. Eager-only (calls
            # bool() on device values -> forces a device->host sync); do not
            # enable inside jax.jit.
            if bool(jnp.isnan(out_re).any() | jnp.isnan(out_im).any()):
                raise ValueError("NaN detected in propagation")
        return output


if __name__ == "__main__":
    # Small deterministic example: batch=2, layer_size=16.
    layer_size = 16
    wavelength = 0.5e-6
    pixel_size = 1.0e-6
    distance = 10.0e-6

    key = jax.random.PRNGKey(0)
    k_re, k_im = jax.random.split(key)
    field_re = jax.random.normal(k_re, (2, layer_size, layer_size), jnp.float32)
    field_im = jax.random.normal(k_im, (2, layer_size, layer_size), jnp.float32)
    field = jax.lax.complex(field_re, field_im)          # complex64 [2, 16, 16]

    # Reference (same math as the module): ifft2(fft2(x) * H).
    prop_f32 = AngularSpectrumPropagation(layer_size, wavelength, pixel_size,
                                          distance, compute_dtype=jnp.float32)
    out_f32 = prop_f32(field)
    jax.block_until_ready(out_f32)
    ref = jnp.fft.ifft2(jnp.fft.fft2(field) * prop_f32.H[None])
    assert jnp.allclose(out_f32, ref, atol=1e-3, rtol=1e-3)

    # Default configuration: bf16 MXU operands with f32 accumulation.
    prop = AngularSpectrumPropagation(layer_size, wavelength, pixel_size, distance)
    out = prop(field)
    jax.block_until_ready(out)
    assert jnp.allclose(out, ref, atol=1e-1, rtol=1e-1)   # bf16-level tolerance

    print("KERNEL_OK")
</pallas_src>

<mosaic_0001>
module attributes {stable_mosaic.version = 11 : i64} {
  func.func @_asp_kernel(%arg0: i32, %arg1: memref<1x16x16xf32, #tpu.memory_space<vmem>>, %arg2: memref<1x16x16xf32, #tpu.memory_space<vmem>>, %arg3: memref<128x128xf32, #tpu.memory_space<vmem>>, %arg4: memref<128x128xf32, #tpu.memory_space<vmem>>, %arg5: memref<128x128xf32, #tpu.memory_space<vmem>>, %arg6: memref<128x128xf32, #tpu.memory_space<vmem>>, %arg7: memref<128x128xf32, #tpu.memory_space<vmem>>, %arg8: memref<128x128xf32, #tpu.memory_space<vmem>>, %arg9: memref<1x16x16xf32, #tpu.memory_space<vmem>>, %arg10: memref<1x16x16xf32, #tpu.memory_space<vmem>>, %arg11: memref<128x128xf32, #tpu.memory_space<vmem>>, %arg12: memref<128x128xf32, #tpu.memory_space<vmem>>) attributes {dimension_semantics = [#tpu.dimension_semantics<parallel>], iteration_bounds = array<i64: 2>, scalar_prefetch = 0 : i64, scratch_operands = 2 : i64, tpu.core_type = #tpu.core_type<tc>, window_params = [{transform_indices = @transform_0, window_bounds = array<i64: 1, 16, 16>}, {transform_indices = @transform_1, window_bounds = array<i64: 1, 16, 16>}, {pipeline_mode = #tpu.pipeline_mode<synchronous>, transform_indices = @transform_2, window_bounds = array<i64: 128, 128>}, {pipeline_mode = #tpu.pipeline_mode<synchronous>, transform_indices = @transform_3, window_bounds = array<i64: 128, 128>}, {pipeline_mode = #tpu.pipeline_mode<synchronous>, transform_indices = @transform_4, window_bounds = array<i64: 128, 128>}, {pipeline_mode = #tpu.pipeline_mode<synchronous>, transform_indices = @transform_5, window_bounds = array<i64: 128, 128>}, {pipeline_mode = #tpu.pipeline_mode<synchronous>, transform_indices = @transform_6, window_bounds = array<i64: 128, 128>}, {pipeline_mode = #tpu.pipeline_mode<synchronous>, transform_indices = @transform_7, window_bounds = array<i64: 128, 128>}, {transform_indices = @transform_8, window_bounds = array<i64: 1, 16, 16>}, {transform_indices = @transform_9, window_bounds = array<i64: 1, 16, 16>}]} {
    %c0 = arith.constant 0 : index
    %c0_0 = arith.constant 0 : index
    %0 = vector.load %arg3[%c0, %c0_0] : memref<128x128xf32, #tpu.memory_space<vmem>>, vector<128x128xf32>
    %c0_1 = arith.constant 0 : index
    %c0_2 = arith.constant 0 : index
    %1 = vector.load %arg4[%c0_1, %c0_2] : memref<128x128xf32, #tpu.memory_space<vmem>>, vector<128x128xf32>
    %c0_3 = arith.constant 0 : index
    %c0_4 = arith.constant 0 : index
    %2 = vector.load %arg5[%c0_3, %c0_4] : memref<128x128xf32, #tpu.memory_space<vmem>>, vector<128x128xf32>
    %c0_5 = arith.constant 0 : index
    %c0_6 = arith.constant 0 : index
    %3 = vector.load %arg6[%c0_5, %c0_6] : memref<128x128xf32, #tpu.memory_space<vmem>>, vector<128x128xf32>
    %c0_7 = arith.constant 0 : index
    %c0_8 = arith.constant 0 : index
    %4 = vector.load %arg7[%c0_7, %c0_8] : memref<128x128xf32, #tpu.memory_space<vmem>>, vector<128x128xf32>
    %c0_9 = arith.constant 0 : index
    %c0_10 = arith.constant 0 : index
    %5 = vector.load %arg8[%c0_9, %c0_10] : memref<128x128xf32, #tpu.memory_space<vmem>>, vector<128x128xf32>
    %cst = arith.constant 0.000000e+00 : f32
    %6 = vector.broadcast %cst : f32 to vector<128x128xf32>
    %c0_11 = arith.constant 0 : index
    %c0_12 = arith.constant 0 : index
    %7 = vector.load %arg11[%c0_11, %c0_12] : memref<128x128xf32, #tpu.memory_space<vmem>>, vector<128x128xf32>
    tpu.vector_store %arg11[%c0_11, %c0_12], %6 {strides = array<i32>} : memref<128x128xf32, #tpu.memory_space<vmem>>, vector<128x128xf32>,
    %cst_13 = arith.constant 0.000000e+00 : f32
    %8 = vector.broadcast %cst_13 : f32 to vector<128x128xf32>
    %c0_14 = arith.constant 0 : index
    %c0_15 = arith.constant 0 : index
    %9 = vector.load %arg12[%c0_14, %c0_15] : memref<128x128xf32, #tpu.memory_space<vmem>>, vector<128x128xf32>
    tpu.vector_store %arg12[%c0_14, %c0_15], %8 {strides = array<i32>} : memref<128x128xf32, #tpu.memory_space<vmem>>, vector<128x128xf32>,
    %c0_16 = arith.constant 0 : index
    %c0_17 = arith.constant 0 : index
    %c0_18 = arith.constant 0 : index
    %10 = vector.load %arg1[%c0_16, %c0_17, %c0_18] : memref<1x16x16xf32, #tpu.memory_space<vmem>>, vector<1x16x16xf32>
    %11 = vector.shape_cast %10 : vector<1x16x16xf32> to vector<16x16xf32>
    %c0_19 = arith.constant 0 : index
    %c0_20 = arith.constant 0 : index
    %12 = vector.load %arg11[%c0_19, %c0_20] : memref<128x128xf32, #tpu.memory_space<vmem>>, vector<16x16xf32>
    tpu.vector_store %arg11[%c0_19, %c0_20], %11 {strides = array<i32>} : memref<128x128xf32, #tpu.memory_space<vmem>>, vector<16x16xf32>,
    %c0_21 = arith.constant 0 : index
    %c0_22 = arith.constant 0 : index
    %c0_23 = arith.constant 0 : index
    %13 = vector.load %arg2[%c0_21, %c0_22, %c0_23] : memref<1x16x16xf32, #tpu.memory_space<vmem>>, vector<1x16x16xf32>
    %14 = vector.shape_cast %13 : vector<1x16x16xf32> to vector<16x16xf32>
    %c0_24 = arith.constant 0 : index
    %c0_25 = arith.constant 0 : index
    %15 = vector.load %arg12[%c0_24, %c0_25] : memref<128x128xf32, #tpu.memory_space<vmem>>, vector<16x16xf32>
    tpu.vector_store %arg12[%c0_24, %c0_25], %14 {strides = array<i32>} : memref<128x128xf32, #tpu.memory_space<vmem>>, vector<16x16xf32>,
    %c0_26 = arith.constant 0 : index
    %c0_27 = arith.constant 0 : index
    %16 = vector.load %arg11[%c0_26, %c0_27] : memref<128x128xf32, #tpu.memory_space<vmem>>, vector<128x128xf32>
    %c0_28 = arith.constant 0 : index
    %c0_29 = arith.constant 0 : index
    %17 = vector.load %arg12[%c0_28, %c0_29] : memref<128x128xf32, #tpu.memory_space<vmem>>, vector<128x128xf32>
    %cst_30 = arith.constant dense<0.000000e+00> : vector<128x128xf32>
    %18 = tpu.matmul %0, %16, %cst_30 {dimension_numbers = #tpu.dot_dimension_numbers<[1], [0], [0], [1], [0, 0, 1, 1], [], []>} : vector<128x128xf32>, vector<128x128xf32>, vector<128x128xf32> -> vector<128x128xf32>
    %cst_31 = arith.constant dense<0.000000e+00> : vector<128x128xf32>
    %19 = tpu.matmul %1, %17, %cst_31 {dimension_numbers = #tpu.dot_dimension_numbers<[1], [0], [0], [1], [0, 0, 1, 1], [], []>} : vector<128x128xf32>, vector<128x128xf32>, vector<128x128xf32> -> vector<128x128xf32>
    %20 = arith.addf %16, %17 : vector<128x128xf32>
    %cst_32 = arith.constant dense<0.000000e+00> : vector<128x128xf32>
    %21 = tpu.matmul %2, %20, %cst_32 {dimension_numbers = #tpu.dot_dimension_numbers<[1], [0], [0], [1], [0, 0, 1, 1], [], []>} : vector<128x128xf32>, vector<128x128xf32>, vector<128x128xf32> -> vector<128x128xf32>
    %22 = arith.subf %18, %19 : vector<128x128xf32>
    %23 = arith.subf %21, %18 : vector<128x128xf32>
    %24 = arith.subf %23, %19 : vector<128x128xf32>
    %cst_33 = arith.constant dense<0.000000e+00> : vector<128x128xf32>
    %25 = tpu.matmul %22, %0, %cst_33 {dimension_numbers = #tpu.dot_dimension_numbers<[1], [0], [0], [1], [0, 0, 1, 1], [], []>} : vector<128x128xf32>, vector<128x128xf32>, vector<128x128xf32> -> vector<128x128xf32>
    %cst_34 = arith.constant dense<0.000000e+00> : vector<128x128xf32>
    %26 = tpu.matmul %24, %1, %cst_34 {dimension_numbers = #tpu.dot_dimension_numbers<[1], [0], [0], [1], [0, 0, 1, 1], [], []>} : vector<128x128xf32>, vector<128x128xf32>, vector<128x128xf32> -> vector<128x128xf32>
    %27 = arith.addf %22, %24 : vector<128x128xf32>
    %cst_35 = arith.constant dense<0.000000e+00> : vector<128x128xf32>
    %28 = tpu.matmul %27, %2, %cst_35 {dimension_numbers = #tpu.dot_dimension_numbers<[1], [0], [0], [1], [0, 0, 1, 1], [], []>} : vector<128x128xf32>, vector<128x128xf32>, vector<128x128xf32> -> vector<128x128xf32>
    %29 = arith.subf %25, %26 : vector<128x128xf32>
    %30 = arith.subf %28, %25 : vector<128x128xf32>
    %31 = arith.subf %30, %26 : vector<128x128xf32>
    %32 = arith.mulf %29, %4 : vector<128x128xf32>
    %33 = arith.mulf %31, %5 : vector<128x128xf32>
    %34 = arith.subf %32, %33 : vector<128x128xf32>
    %35 = arith.mulf %29, %5 : vector<128x128xf32>
    %36 = arith.mulf %31, %4 : vector<128x128xf32>
    %37 = arith.addf %35, %36 : vector<128x128xf32>
    %cst_36 = arith.constant dense<0.000000e+00> : vector<128x128xf32>
    %38 = tpu.matmul %0, %34, %cst_36 {dimension_numbers = #tpu.dot_dimension_numbers<[1], [0], [0], [1], [0, 0, 1, 1], [], []>} : vector<128x128xf32>, vector<128x128xf32>, vector<128x128xf32> -> vector<128x128xf32>
    %cst_37 = arith.constant dense<0.000000e+00> : vector<128x128xf32>
    %39 = tpu.matmul %1, %37, %cst_37 {dimension_numbers = #tpu.dot_dimension_numbers<[1], [0], [0], [1], [0, 0, 1, 1], [], []>} : vector<128x128xf32>, vector<128x128xf32>, vector<128x128xf32> -> vector<128x128xf32>
    %40 = arith.addf %34, %37 : vector<128x128xf32>
    %cst_38 = arith.constant dense<0.000000e+00> : vector<128x128xf32>
    %41 = tpu.matmul %3, %40, %cst_38 {dimension_numbers = #tpu.dot_dimension_numbers<[1], [0], [0], [1], [0, 0, 1, 1], [], []>} : vector<128x128xf32>, vector<128x128xf32>, vector<128x128xf32> -> vector<128x128xf32>
    %42 = arith.addf %38, %39 : vector<128x128xf32>
    %43 = arith.subf %41, %38 : vector<128x128xf32>
    %44 = arith.addf %43, %39 : vector<128x128xf32>
    %cst_39 = arith.constant dense<0.000000e+00> : vector<128x128xf32>
    %45 = tpu.matmul %42, %0, %cst_39 {dimension_numbers = #tpu.dot_dimension_numbers<[1], [0], [0], [1], [0, 0, 1, 1], [], []>} : vector<128x128xf32>, vector<128x128xf32>, vector<128x128xf32> -> vector<128x128xf32>
    %cst_40 = arith.constant dense<0.000000e+00> : vector<128x128xf32>
    %46 = tpu.matmul %44, %1, %cst_40 {dimension_numbers = #tpu.dot_dimension_numbers<[1], [0], [0], [1], [0, 0, 1, 1], [], []>} : vector<128x128xf32>, vector<128x128xf32>, vector<128x128xf32> -> vector<128x128xf32>
    %47 = arith.addf %42, %44 : vector<128x128xf32>
    %cst_41 = arith.constant dense<0.000000e+00> : vector<128x128xf32>
    %48 = tpu.matmul %47, %3, %cst_41 {dimension_numbers = #tpu.dot_dimension_numbers<[1], [0], [0], [1], [0, 0, 1, 1], [], []>} : vector<128x128xf32>, vector<128x128xf32>, vector<128x128xf32> -> vector<128x128xf32>
    %49 = arith.addf %45, %46 : vector<128x128xf32>
    %50 = arith.subf %48, %45 : vector<128x128xf32>
    %51 = arith.addf %50, %46 : vector<128x128xf32>
    %52 = vector.extract_strided_slice %49 {offsets = [0, 0], sizes = [16, 16], strides = [1, 1]} : vector<128x128xf32> to vector<16x16xf32>
    %c0_42 = arith.constant 0 : index
    %c0_43 = arith.constant 0 : index
    %c0_44 = arith.constant 0 : index
    %53 = vector.load %arg9[%c0_42, %c0_43, %c0_44] : memref<1x16x16xf32, #tpu.memory_space<vmem>>, vector<1x16x16xf32>
    %54 = vector.shape_cast %53 : vector<1x16x16xf32> to vector<16x16xf32>
    %55 = vector.shape_cast %52 : vector<16x16xf32> to vector<1x16x16xf32>
    tpu.vector_store %arg9[%c0_42, %c0_43, %c0_44], %55 {strides = array<i32>} : memref<1x16x16xf32, #tpu.memory_space<vmem>>, vector<1x16x16xf32>,
    %56 = vector.extract_strided_slice %51 {offsets = [0, 0], sizes = [16, 16], strides = [1, 1]} : vector<128x128xf32> to vector<16x16xf32>
    %c0_45 = arith.constant 0 : index
    %c0_46 = arith.constant 0 : index
    %c0_47 = arith.constant 0 : index
    %57 = vector.load %arg10[%c0_45, %c0_46, %c0_47] : memref<1x16x16xf32, #tpu.memory_space<vmem>>, vector<1x16x16xf32>
    %58 = vector.shape_cast %57 : vector<1x16x16xf32> to vector<16x16xf32>
    %59 = vector.shape_cast %56 : vector<16x16xf32> to vector<1x16x16xf32>
    tpu.vector_store %arg10[%c0_45, %c0_46, %c0_47], %59 {strides = array<i32>} : memref<1x16x16xf32, #tpu.memory_space<vmem>>, vector<1x16x16xf32>,
    return
  }
  func.func @transform_0(%arg0: i32) -> (i32, i32, i32) {
    %c0_i32 = arith.constant 0 : i32
    %c0_i32_0 = arith.constant 0 : i32
    %c0_i32_1 = arith.constant 0 : i32
    return %arg0, %c0_i32, %c0_i32_0 : i32, i32, i32
  }
  func.func @transform_1(%arg0: i32) -> (i32, i32, i32) {
    %c0_i32 = arith.constant 0 : i32
    %c0_i32_0 = arith.constant 0 : i32
    %c0_i32_1 = arith.constant 0 : i32
    return %arg0, %c0_i32, %c0_i32_0 : i32, i32, i32
  }
  func.func @transform_2(%arg0: i32) -> (i32, i32) {
    %c0_i32 = arith.constant 0 : i32
    %c0_i32_0 = arith.constant 0 : i32
    %c0_i32_1 = arith.constant 0 : i32
    return %c0_i32, %c0_i32_0 : i32, i32
  }
  func.func @transform_3(%arg0: i32) -> (i32, i32) {
    %c0_i32 = arith.constant 0 : i32
    %c0_i32_0 = arith.constant 0 : i32
    %c0_i32_1 = arith.constant 0 : i32
    return %c0_i32, %c0_i32_0 : i32, i32
  }
  func.func @transform_4(%arg0: i32) -> (i32, i32) {
    %c0_i32 = arith.constant 0 : i32
    %c0_i32_0 = arith.constant 0 : i32
    %c0_i32_1 = arith.constant 0 : i32
    return %c0_i32, %c0_i32_0 : i32, i32
  }
  func.func @transform_5(%arg0: i32) -> (i32, i32) {
    %c0_i32 = arith.constant 0 : i32
    %c0_i32_0 = arith.constant 0 : i32
    %c0_i32_1 = arith.constant 0 : i32
    return %c0_i32, %c0_i32_0 : i32, i32
  }
  func.func @transform_6(%arg0: i32) -> (i32, i32) {
    %c0_i32 = arith.constant 0 : i32
    %c0_i32_0 = arith.constant 0 : i32
    %c0_i32_1 = arith.constant 0 : i32
    return %c0_i32, %c0_i32_0 : i32, i32
  }
  func.func @transform_7(%arg0: i32) -> (i32, i32) {
    %c0_i32 = arith.constant 0 : i32
    %c0_i32_0 = arith.constant 0 : i32
    %c0_i32_1 = arith.constant 0 : i32
    return %c0_i32, %c0_i32_0 : i32, i32
  }
  func.func @transform_8(%arg0: i32) -> (i32, i32, i32) {
    %c0_i32 = arith.constant 0 : i32
    %c0_i32_0 = arith.constant 0 : i32
    %c0_i32_1 = arith.constant 0 : i32
    return %arg0, %c0_i32, %c0_i32_0 : i32, i32, i32
  }
  func.func @transform_9(%arg0: i32) -> (i32, i32, i32) {
    %c0_i32 = arith.constant 0 : i32
    %c0_i32_0 = arith.constant 0 : i32
    %c0_i32_1 = arith.constant 0 : i32
    return %arg0, %c0_i32, %c0_i32_0 : i32, i32, i32
  }
}

</mosaic_0001>

<bundles_post_ra>
// kernel: tpu_custom_call.1
= control target key start
LH: loop header
LB: loop body
LE: loop exit
PB: predicated region body
PF: predicated region fallthrough
CT: control target
= control target key end

     0   :  { %s3192_s0 = inlined_call_operand.hbm [shape: f32[2,16,16], index: 0, kind: input, shape index: {}]   ;;  %s3193_s1 = inlined_call_operand.hbm [shape: f32[2,16,16], index: 1, kind: input, shape index: {}]   ;;  %s3194_s2 = inlined_call_operand.hbm [shape: f32[128,128], index: 2, kind: input, shape index: {}]   ;;  %s3195_s3 = inlined_call_operand.hbm [shape: f32[128,128], index: 3, kind: input, shape index: {}]   ;;  %s3196_s4 = inlined_call_operand.hbm [shape: f32[128,128], index: 4, kind: input, shape index: {}]   ;;  %s3197_s5 = inlined_call_operand.hbm [shape: f32[128,128], index: 5, kind: input, shape index: {}]   ;;  %s3198_s6 = inlined_call_operand.hbm [shape: f32[128,128], index: 6, kind: input, shape index: {}]   ;;  %s3199_s7 = inlined_call_operand.hbm [shape: f32[128,128], index: 7, kind: input, shape index: {}]   ;;  %s3200_s8 = inlined_call_operand.hbm [shape: f32[2,16,16], index: 8, kind: output, shape index: {0}]   ;;  %s3201_s9 = inlined_call_operand.hbm [shape: f32[2,16,16], index: 9, kind: output, shape index: {1}]  }
   0x1   :  { %3208 = sst [smem:[#allocation32_spill]] %s3192_s0 }
   0x2   :  { %3209 = sst [smem:[#allocation33_spill]] %s3194_s2 }
   0x3   :  { %3210 = sst [smem:[#allocation34_spill]] %s3195_s3 }
   0x4   :  { %3211 = sst [smem:[#allocation35_spill]] %s3196_s4 }
   0x5   :  { %3212 = sst [smem:[#allocation36_spill]] %s3197_s5 }
   0x6   :  { %3213 = sst [smem:[#allocation37_spill]] %s3198_s6 }
   0x7   :  { %3214 = sst [smem:[#allocation38_spill]] %s3199_s7 }
   0x8   :  { %15 = vsyncpa [#allocation5], 0 }
   0x9   :  { %17 = vsyncpa [#allocation5 + $0x1], 0 }
   0xa   :  { %18 = vsyncpa [#allocation8], 0 }
   0xb   :  { %20 = vsyncpa [#allocation8 + $0x1], 0 }
   0xc   :  { %21 = vsyncpa [#allocation11], 0 }
   0xd   :  { %22 = vsyncpa [#allocation14], 0 }
   0xe   :  { %23 = vsyncpa [#allocation17], 0 }
   0xf   :  { %24 = vsyncpa [#allocation6], 0 }
  0x10   :  { %26 = vsyncpa [#allocation6 + $0x1], 0 }
  0x11   :  { %27 = vsyncpa [#allocation20], 0 }
  0x12   :  { %29 = vsyncpa [#allocation20 + $0x1], 0  ;;  %s2563_s30 = smov 0   ;;  %s2565_s10 = smov 0  }
  0x13   :  { %s2567_s11 = smov 0   ;;  %s2569_s12 = smov 0  }
  0x14 LB: > { %s3215_s2 = sld [smem:[#allocation33_spill]]  ;;  %s2587_s16 = sadd.s32 4294967295, %s2500_s12   ;;  %s2500_s12 = sphi %s2569_s12, %s3244_s12   ;;  %s2496_s11 = sphi %s2567_s11, %s3243_s11   ;;  %s2492_s10 = sphi %s2565_s10, %s3242_s10   ;;  %s2488_s30 = sphi %s2563_s30, %s3241_s30  }
  0x15   : > { %p1951_p0 = scmp.ge.s32.totalorder %s2500_s12, 1  ;;  %p56_p1 = scmp.eq.s32.totalorder %s2587_s16, 0 }
  0x16   : > { %p270_p2 = scmp.lt.s32.totalorder %s2500_s12, 3  ;;  %s2502_s18 = smov [#allocation9]  }
  0x17   : > { %s283_s19 = sshll.u32 %s2502_s18, 4  ;;  %s3217_s3 = sld [smem:[#allocation34_spill]]  ;;  %s284_s19 = int_to_ptr.vmem [resolvable:$true] %s283_s19 }
  0x18   : > { %p2592_p3 = pnand %p1951_p0, %p270_p2  ;;  %s3219_s5 = sld [smem:[#allocation36_spill]] }
  0x19   : > { %s2503_s27 = smov [#allocation10]   ;;  %s3202_s29 = smov 128  }
  0x1a   : > { %s281_s15 = sshll.u32 %s3215_s2, 4  ;;  %p2020_p4 = pneg %p2592_p3  ;;  %s282_s15 = int_to_ptr.hbm [resolvable:$true] %s281_s15 }
  0x1b   : > { %s297_s28 = sshll.u32 %s2503_s27, 4  ;;  %s3204_s13 = smov 8   ;;  %s298_s28 = int_to_ptr.vmem [resolvable:$true] %s297_s28 }
  0x1c   : > { %p2604_p6 = pnand %p2020_p4, %p56_p1  ;;  %s3220_s4 = sld [smem:[#allocation35_spill]] }
  0x1d   : > { %s295_s22 = sshll.u32 %s3217_s3, 4  ;;  %s2506_s21 = smov [#allocation13]   ;;  %s296_s22 = int_to_ptr.hbm [resolvable:$true] %s295_s22 }
  0x1e   : > { %s323_s26 = sshll.u32 %s3219_s5, 4  ;;  %s325_s24 = sshll.u32 %s2506_s21, 4  ;;  %s324_s26 = int_to_ptr.hbm [resolvable:$true] %s323_s26  ;;  %s326_s24 = int_to_ptr.vmem [resolvable:$true] %s325_s24 }
  0x1f   : > { %2023 = dma.hbm_to_vmem [thread:$0]  (!%p2604_p6), %s282_s15, 2048, %s284_s19, [#allocation8], %s3202_s29, %s3202_s29, %s3204_s13  }
  0x20   : > { %2026 = dma.hbm_to_vmem [thread:$0]  (!%p2604_p6), %s296_s22, 2048, %s298_s28, [#allocation11], %s3202_s29, %s3202_s29, %s3204_s13  }
  0x21   : > { %2032 = dma.hbm_to_vmem [thread:$0]  (!%p2604_p6), %s324_s26, 2048, %s326_s24, [#allocation14], %s3202_s29, %s3202_s29, %s3204_s13  }
  0x22   : > { %s309_s20 = sshll.u32 %s3220_s4, 4  ;;  %s2507_s15 = smov [#allocation12]   ;;  %s310_s20 = int_to_ptr.hbm [resolvable:$true] %s309_s20 }
  0x23   : > { %s311_s19 = sshll.u32 %s2507_s15, 4  ;;  %s3221_s6 = sld [smem:[#allocation37_spill]]  ;;  %s312_s19 = int_to_ptr.vmem [resolvable:$true] %s311_s19 }
  0x24   : > { %2029 = dma.hbm_to_vmem [thread:$0]  (!%p2604_p6), %s310_s20, 2048, %s312_s19, [#allocation11], %s3202_s29, %s3202_s29, %s3204_s13  }
  0x25   : > { %s3222_s7 = sld [smem:[#allocation38_spill]]  ;;  %s2508_s18 = smov [#allocation15]  }
  0x26   : > { %s339_s21 = sshll.u32 %s2508_s18, 4  ;;  %s2509_s20 = smov [#allocation16]   ;;  %s340_s21 = int_to_ptr.vmem [resolvable:$true] %s339_s21 }
  0x27   : > { %s353_s24 = sshll.u32 %s2509_s20, 4  ;;  %s1950_s15 = sadd.s32 4294967294, %s2500_s12   ;;  %s354_s24 = int_to_ptr.vmem [resolvable:$true] %s353_s24 }
  0x28   : > { %s2652_s19 = sadd.s32 1, %s2500_s12   ;;  %s42_s22 = sadd.s32 1, %s2496_s11 }
  0x29   : > { %s337_s27 = sshll.u32 %s3221_s6, 4  ;;  %s39_s25 = ssub.s32 %s2500_s12, %s2652_s19  ;;  %s338_s27 = int_to_ptr.hbm [resolvable:$true] %s337_s27 }
  0x2a   : > { %2035 = dma.hbm_to_vmem [thread:$0]  (!%p2604_p6), %s338_s27, 2048, %s340_s21, [#allocation14], %s3202_s29, %s3202_s29, %s3204_s13  }
  0x2b   : > { %s351_s14 = sshll.u32 %s3222_s7, 4  ;;  %p40_p7 = scmp.eq.s32.totalorder %s39_s25, 0  ;;  %s352_s14 = int_to_ptr.hbm [resolvable:$true] %s351_s14 }
  0x2c   : > { %2038 = dma.hbm_to_vmem [thread:$0]  (!%p2604_p6), %s352_s14, 2048, %s354_s24, [#allocation17], %s3202_s29, %s3202_s29, %s3204_s13  }
  0x2d   : > { %p49_p8 = scmp.ne.s32.totalorder %s2496_s11, %s2492_s10  ;;  %p50_p9 = scmp.eq.s32.totalorder %s2500_s12, 0 }
  0x2e   : > { %p55_p10 = scmp.ne.s32.totalorder %s2492_s10, %s2488_s30  ;;  %p231_p13 = scmp.eq.s32.totalorder %s2587_s16, 1 }
  0x2f   : > { %s2663_s27 = scalar_select %p40_p7, %s2496_s11, %s42_s22  }
  0x30   : > { %p2665_p11 = por %p50_p9, %p49_p8  ;;  %p2671_p12 = por %p56_p1, %p55_p10 }
  0x31   : > { %3223 = sst [smem:[#allocation29_spill]] %s2663_s27  ;;  %p237_p0 = scmp.eq.s32.totalorder %s1950_s15, 1 }
  0x32   : > { %p2059_p2 = scmp.lt.s32.totalorder %s2500_s12, 2  ;;  %s367_s26 = sand.u32 1, %s2496_s11  }
  0x33   : > { %p2678_p4 = por %p231_p13, %p49_p8  ;;  %p2682_p6 = por %p237_p0, %p55_p10 }
  0x34   : > { %s2686_s21 = sshll.u32 %s367_s26, 4  ;;  %s1984_s20 = sshll.u32 %s2500_s12, 4 }
  0x35   : > { %s3228_s0 = sld [smem:[#allocation32_spill]]  ;;  %s371_s29 = scalar_lea.vmem [#allocation4], %s2686_s21 }
  0x36   : > { %s379_s15 = sshll.u32 %s371_s29, 4  ;;  %p2695_p7 = pnand %p2059_p2, %p2665_p11  ;;  %s380_s15 = int_to_ptr.vmem [resolvable:$true] %s379_s15 }
  0x37   : > { %s398_s5 = scalar_lea.hbm %s3193_s1, %s1984_s20  ;;  %s368_s7 = scalar_lea.sflag [#allocation5], %s367_s26 }
  0x38   : > { %s399_s6 = sshll.u32 %s398_s5, 4  ;;  %p2326_p9 = pneg %p2695_p7  ;;  %s400_s6 = int_to_ptr.hbm [resolvable:$true] %s399_s6 }
  0x3b   : > { %s376_s22 = scalar_lea.hbm %s3228_s0, %s1984_s20 }
  0x3c   : > { %s377_s13 = sshll.u32 %s376_s22, 4  ;;  %s2329_s22 = scalar_lea.hbm %s3228_s0, 32  ;;  %s378_s13 = int_to_ptr.hbm [resolvable:$true] %s377_s13 }
  0x3d   : > { %s2322_s24 = sshra.s32 %s378_s13, 4  ;;  %s2323_s24 = int_to_ptr.hbm [resolvable:$true] %s2322_s24 }
  0x3e   : > { %s2324_s25 = scalar_lea.hbm %s2323_s24, 16  ;;  %p2330_p13 = scmp.lt.s32.totalorder %s2323_s24, %s3228_s0 }
  0x3f   : > { %p2325_p8 = scmp.ne.s32.totalorder %s2323_s24, %s2324_s25  ;;  %p2331_p0 = scmp.lt.s32.totalorder %s2329_s22, %s2324_s25 }
  0x41   : > { %p2327_p10 = pnand %p2326_p9, %p2325_p8  ;;  %p2332_p2 = por %p2331_p0, %p2330_p13 }
  0x43   : > { %p2328_p11 = pneg %p2327_p10 }
  0x45   : > { %p2333_p5 = pnand %p2332_p2, %p2328_p11 }
  0x47   : > { %2336 = shalt.err (!%p2333_p5)
}
  0x48   : > { %s3230_s5 = smov 8   ;;  %s3231_s26 = smov 128  }
  0x49   : > { %2042 = dma.hbm_to_vmem [thread:$0]  (!%p2695_p7), %s378_s13, 256, %s380_s15, %s368_s7, %s3231_s26, %s3231_s26, %s3230_s5  }
  0x4a   : > { %s393_s20 = scalar_lea.vmem [#allocation7], %s2686_s21  ;;  %s389_s23 = sand.u32 1, %s2500_s12  }
  0x4b   : > { %s401_s29 = sshll.u32 %s393_s20, 4  ;;  %s390_s3 = scalar_lea.sflag [#allocation8], %s389_s23  ;;  %s402_s29 = int_to_ptr.vmem [resolvable:$true] %s401_s29 }
  0x4c   : > { %s2352_s24 = sshra.s32 %s400_s6, 4  ;;  %s2359_s0 = scalar_lea.hbm %s3193_s1, 32  ;;  %s2353_s24 = int_to_ptr.hbm [resolvable:$true] %s2352_s24 }
  0x4d   : > { %s2354_s25 = scalar_lea.hbm %s2353_s24, 16  ;;  %p2360_p11 = scmp.lt.s32.totalorder %s2353_s24, %s3193_s1 }
  0x4e   : > { %p2355_p8 = scmp.ne.s32.totalorder %s2353_s24, %s2354_s25  ;;  %p2361_p13 = scmp.lt.s32.totalorder %s2359_s0, %s2354_s25 }
  0x50   : > { %p2357_p5 = pnand %p2355_p8, %p2326_p9  ;;  %p2362_p0 = por %p2361_p13, %p2360_p11 }
  0x52   : > { %p2358_p10 = pneg %p2357_p5 }
  0x54   : > { %p2363_p2 = pnand %p2362_p0, %p2358_p10 }
  0x56   : > { %2366 = shalt.err (!%p2363_p2)
}
  0x57   : > { %2045 = dma.hbm_to_vmem [thread:$0]  (!%p2695_p7), %s400_s6, 256, %s402_s29, %s390_s3, %s3231_s26, %s3231_s26, %s3230_s5  }
  0x58   : > { %413 = sbr.rel (%p2592_p3) target bundleno = 963 (0x3c3), region = 52 }
  0x5d   : > { %s2737_s13 = sand.u32 1, %s2492_s10  }
  0x5e   : > { %s2740_s27 = sshll.u32 %s2737_s13, 4  ;;  %s416_s0 = scalar_lea.sflag [#allocation5], %s2737_s13 }
  0x5f   : > { %s419_s21 = scalar_lea.vmem [#allocation4], %s2740_s27 }
  0x60   : > { %2455 = dma.done.wait (%p2671_p12), %s416_s0, 256  }
  0x61   : > { %2457 = vsyncadd (%p2671_p12), %s416_s0, 4294967040  ;;  %s425_s2 = sand.u32 1, %s2587_s16   ;;  %s429_s17 = scalar_lea.vmem [#allocation7], %s2740_s27 }
  0x62   : > { %s426_s6 = scalar_lea.sflag [#allocation8], %s425_s2 }
  0x63   : > { %2459 = dma.done.wait (%p2671_p12), %s426_s6, 256  }
  0x64   : > { %2461 = vsyncadd (%p2671_p12), %s426_s6, 4294967040 }
  0x65   : > { %2463 = dma.done.wait (%p56_p1), [#allocation8], 2048  }
  0x66   : > { %2465 = vsyncadd (%p56_p1), [#allocation8], 4294965248 }
  0x67   : > { %2467 = dma.done.wait (%p56_p1), [#allocation11], 4096  }
  0x68   : > { %2469 = vsyncadd (%p56_p1), [#allocation11], 4294963200 }
  0x69   : > { %2471 = dma.done.wait (%p56_p1), [#allocation14], 4096  }
  0x6a   : > { %2473 = vsyncadd (%p56_p1), [#allocation14], 4294963200 }
  0x6b   : > { %2475 = dma.done.wait (%p56_p1), [#allocation17], 2048  }
  0x6c   : > { %2477 = vsyncadd (%p56_p1), [#allocation17], 4294965248  ;;  %v2510_v0 = vmov 0.0   ;;  %v634_v1 = vld [vmem:[%s419_s21 + $0x8] sm:$0xff]  ;;  %vm635_vm0 = vcmask 130048   ;;  %v633_v3 = vld [vmem:[%s419_s21] sm:$0xff] }
  0x6d   : > { %674 = vmatpush.msra.mxu0 %v2510_v0  ;;  %739 = vmatpush.msra.mxu1 %v2510_v0  ;;  %601 = vst [vmem:[#allocation2] sm:$0xff] %v2510_v0  ;;  %v639_v2 = vld [vmem:[%s429_s17 + $0x8] sm:$0xff]  ;;  %v638_v4 = vld [vmem:[%s429_s17] sm:$0xff]  ;;  %s1986_s28 = sshll.u32 %s2587_s16, 4  ;;  %s497_s20 = scalar_lea.vmem [#allocation18], %s2740_s27 }
  0x6e   : > { %820 = vmatpush.msra.mxu2 %v2510_v0  ;;  %602 = vst [vmem:[#allocation2 + $0x8] sm:$0xff] %v2510_v0  ;;  %v2782_v9 = vld [vmem:[#allocation9] sm:$0xff]  ;;  %v2791_v14 = vld [vmem:[#allocation9 + $0x8] sm:$0xff]  ;;  %v2800_v17 = vld [vmem:[#allocation9 + $0x10] sm:$0xff]  ;;  %s1743_s26 = scalar_lea.hbm %s3200_s8, %s1986_s28  ;;  %s1744_s29 = sshll.u32 %s497_s20, 4  ;;  %s1745_s29 = int_to_ptr.vmem [resolvable:$true] %s1744_s29 }
  0x6f   : > { %675 = vmatpush.msra.mxu0 %v2510_v0  ;;  %740 = vmatpush.msra.mxu1 %v2510_v0  ;;  %617 = vst [vmem:[#allocation3] sm:$0xff] %v2510_v0  ;;  %v2784_v10 = vld [vmem:[#allocation10] sm:$0xff]  ;;  %v2793_v15 = vld [vmem:[#allocation10 + $0x8] sm:$0xff]  ;;  %v2802_v18 = vld [vmem:[#allocation10 + $0x10] sm:$0xff]  ;;  %s1746_s23 = sshll.u32 %s1743_s26, 4  ;;  %s3138_s3 = scalar_lea.vmem [#allocation19], %s2740_s27  ;;  %s1747_s23 = int_to_ptr.hbm [resolvable:$true] %s1746_s23 }
  0x70   : > { %821 = vmatpush.msra.mxu2 %v2510_v0  ;;  %618 = vst [vmem:[#allocation3 + $0x8] sm:$0xff] %v2510_v0  ;;  %v2786_v13 = vld [vmem:[#allocation12] sm:$0xff]  ;;  %v2795_v16 = vld [vmem:[#allocation12 + $0x8] sm:$0xff]  ;;  %v2804_v19 = vld [vmem:[#allocation12 + $0x10] sm:$0xff]  ;;  %s3145_s25 = scalar_lea.hbm %s3201_s9, %s1986_s28  ;;  %s1761_s22 = sshll.u32 %s3138_s3, 4  ;;  %s1762_s22 = int_to_ptr.vmem [resolvable:$true] %s1761_s22 }
  0x71   : > { %676 = vmatpush.msra.mxu0 %v2510_v0  ;;  %741 = vmatpush.msra.mxu1 %v2510_v0  ;;  %637 = vst.msk [vmem:[#allocation2 + $0x8] sm:$0xff] %vm635_vm0, %v634_v1  ;;  %v2809_v20 = vld [vmem:[#allocation9 + $0x18] sm:$0xff]  ;;  %v2818_v23 = vld [vmem:[#allocation9 + $0x20] sm:$0xff]  ;;  %v2827_v26 = vld [vmem:[#allocation9 + $0x28] sm:$0xff]  ;;  %s1763_s4 = sshll.u32 %s3145_s25, 4  ;;  %s1727_s7 = scalar_lea.sflag [#allocation6], %s2737_s13  ;;  %s1764_s4 = int_to_ptr.hbm [resolvable:$true] %s1763_s4 }
  0x72   : > { %822 = vmatpush.msra.mxu2 %v2510_v0  ;;  %641 = vst.msk [vmem:[#allocation3 + $0x8] sm:$0xff] %vm635_vm0, %v639_v2  ;;  %v2811_v21 = vld [vmem:[#allocation10 + $0x18] sm:$0xff]  ;;  %v2820_v24 = vld [vmem:[#allocation10 + $0x20] sm:$0xff]  ;;  %v2829_v27 = vld [vmem:[#allocation10 + $0x28] sm:$0xff]  ;;  %s2396_s27 = sshra.s32 %s1747_s23, 4  ;;  %s2402_s6 = scalar_lea.hbm %s3200_s8, 32  ;;  %s2397_s27 = int_to_ptr.hbm [resolvable:$true] %s2396_s27 }
  0x73   : > { %677 = vmatpush.msra.mxu0 %v2510_v0  ;;  %742 = vmatpush.msra.mxu1 %v2510_v0  ;;  %636 = vst.msk [vmem:[#allocation2] sm:$0xff] %vm635_vm0, %v633_v3  ;;  %v2813_v22 = vld [vmem:[#allocation12 + $0x18] sm:$0xff]  ;;  %v2822_v25 = vld [vmem:[#allocation12 + $0x20] sm:$0xff]  ;;  %v2831_v28 = vld [vmem:[#allocation12 + $0x28] sm:$0xff]  ;;  %s2398_s0 = scalar_lea.hbm %s2397_s27, 16  ;;  %p2403_p7 = scmp.lt.s32.totalorder %s2397_s27, %s3200_s8 }
  0x74   : > { %823 = vmatpush.msra.mxu2 %v2510_v0  ;;  %640 = vst.msk [vmem:[#allocation3] sm:$0xff] %vm635_vm0, %v638_v4  ;;  %v2836_v29 = vld [vmem:[#allocation9 + $0x30] sm:$0xff]  ;;  %v2845_v32 = vld [vmem:[#allocation9 + $0x38] sm:$0xff]  ;;  %v2854_v35 = vld [vmem:[#allocation9 + $0x40] sm:$0xff]  ;;  %p2399_p1 = scmp.ne.s32.totalorder %s2397_s27, %s2398_s0  ;;  %p2404_p9 = scmp.lt.s32.totalorder %s2402_s6, %s2398_s0 }
  0x75   : > { %678 = vmatpush.msra.mxu0 %v2510_v0  ;;  %743 = vmatpush.msra.mxu1 %v2510_v0  ;;  %v2838_v30 = vld [vmem:[#allocation10 + $0x30] sm:$0xff]  ;;  %v2847_v33 = vld [vmem:[#allocation10 + $0x38] sm:$0xff]  ;;  %v529_v36 = vld [vmem:[#allocation10 + $0x40] sm:$0xff] }
  0x76   : > { %824 = vmatpush.msra.mxu2 %v2510_v0  ;;  %v2840_v31 = vld [vmem:[#allocation12 + $0x30] sm:$0xff]  ;;  %v2849_v34 = vld [vmem:[#allocation12 + $0x38] sm:$0xff]  ;;  %v545_v37 = vld [vmem:[#allocation12 + $0x40] sm:$0xff]  ;;  %p2400_p3 = pnand %p2399_p1, %p2678_p4  ;;  %p2405_p8 = por %p2404_p9, %p2403_p7 }
  0x77   : > { %679 = vmatpush.msra.mxu0 %v2510_v0  ;;  %744 = vmatpush.msra.mxu1 %v2510_v0  ;;  %v2857_v38 = vld [vmem:[#allocation9 + $0x78] sm:$0xff]  ;;  %v2860_v39 = vld [vmem:[#allocation9 + $0x70] sm:$0xff]  ;;  %v2862_v40 = vld [vmem:[#allocation9 + $0x68] sm:$0xff] }
  0x78   : > { %825 = vmatpush.msra.mxu2 %v2510_v0  ;;  %v643_v5 = vld [vmem:[#allocation2 + $0x8] sm:$0xff]  ;;  %933 = vmatpush.msra.mxu3 %v2857_v38  ;;  %v2869_v44 = vld [vmem:[#allocation9 + $0x60] sm:$0xff]  ;;  %v2872_v45 = vld [vmem:[#allocation9 + $0x58] sm:$0xff]  ;;  %p2401_p12 = pneg %p2400_p3 }
  0x79   : > { %680 = vmatpush.msra.mxu0 %v2510_v0  ;;  %745 = vmatpush.msra.mxu1 %v2510_v0  ;;  %v659_v6 = vld [vmem:[#allocation3 + $0x8] sm:$0xff]  ;;  %v2874_v46 = vld [vmem:[#allocation10 + $0x78] sm:$0xff]  ;;  %v2876_v47 = vld [vmem:[#allocation10 + $0x70] sm:$0xff] }
  0x7a   : > { %826 = vmatpush.msra.mxu2 %v2510_v0  ;;  %v805_v7 = vadd.f32 %v659_v6, %v643_v5  ;;  %v642_v8 = vld [vmem:[#allocation2] sm:$0xff]  ;;  %v2864_v41 = vld [vmem:[#allocation9 + $0x48] sm:$0xff]  ;;  %934 = vmatpush.msra.mxu3 %v2860_v39  ;;  %v2880_v48 = vld [vmem:[#allocation12 + $0x78] sm:$0xff]  ;;  %p2406_p5 = pnand %p2405_p8, %p2401_p12 }
  0x7b   : > { %681 = vmatpush.msra.mxu0 %v2510_v0  ;;  %746 = vmatpush.msra.mxu1 %v2510_v0  ;;  %v658_v11 = vld [vmem:[#allocation3] sm:$0xff]  ;;  %v530_v42 = vld [vmem:[#allocation10 + $0x48] sm:$0xff]  ;;  %v2882_v49 = vld [vmem:[#allocation12 + $0x70] sm:$0xff] }
  0x7c   : > { %827 = vmatpush.msra.mxu2 %v2510_v0  ;;  %v804_v12 = vadd.f32 %v658_v11, %v642_v8  ;;  %v546_v43 = vld [vmem:[#allocation12 + $0x48] sm:$0xff]  ;;  %935 = vmatpush.msra.mxu3 %v2862_v40  ;;  %v2884_v50 = vld [vmem:[#allocation9 + $0x50] sm:$0xff]  ;;  %v533_v54 = vld [vmem:[#allocation10 + $0x60] sm:$0xff] }
  0x7d   : > { %682 = vmatpush.msra.mxu0 %v2510_v0  ;;  %747 = vmatpush.msra.mxu1 %v2510_v0  ;;  %v531_v51 = vld [vmem:[#allocation10 + $0x50] sm:$0xff]  ;;  %v534_v52 = vld [vmem:[#allocation10 + $0x68] sm:$0xff]  ;;  %v532_v56 = vld [vmem:[#allocation10 + $0x58] sm:$0xff] }
  0x7e   : > { %828 = vmatpush.msra.mxu2 %v2510_v0  ;;  %936 = vmatpush.msra.mxu3 %v2869_v44  ;;  %v547_v53 = vld [vmem:[#allocation12 + $0x50] sm:$0xff]  ;;  %v550_v55 = vld [vmem:[#allocation12 + $0x68] sm:$0xff]  ;;  %v549_v57 = vld [vmem:[#allocation12 + $0x60] sm:$0xff] }
  0x7f   : > { %683 = vmatpush.msra.mxu0 %v2510_v0  ;;  %748 = vmatpush.msra.mxu1 %v2510_v0  ;;  %v548_v58 = vld [vmem:[#allocation12 + $0x58] sm:$0xff] }
  0x80   : > { %829 = vmatpush.msra.mxu2 %v2510_v0  ;;  %937 = vmatpush.msra.mxu3 %v2872_v45 }
  0x81   : > { %684 = vmatpush.msra.mxu0 %v2510_v0  ;;  %749 = vmatpush.msra.mxu1 %v2510_v0 }
  0x82   : > { %830 = vmatpush.msra.mxu2 %v2510_v0  ;;  %938 = vmatpush.msra.mxu3 %v2884_v50 }
  0x83   : > { %685 = vmatpush.msra.mxu0 %v2510_v0  ;;  %750 = vmatpush.msra.mxu1 %v2510_v0 }
  0x84   : > { %831 = vmatpush.msra.mxu2 %v2510_v0  ;;  %939 = vmatpush.msra.mxu3 %v2864_v41 }
  0x85   : > { %686 = vmatpush.msra.mxu0 %v2510_v0  ;;  %751 = vmatpush.msra.mxu1 %v2510_v0 }
  0x86   : > { %832 = vmatpush.msra.mxu2 %v2510_v0  ;;  %940 = vmatpush.msra.mxu3 %v2854_v35 }
  0x87   : > { %687 = vmatpush.msra.mxu0 %v2510_v0  ;;  %752 = vmatpush.msra.mxu1 %v2510_v0 }
  0x88   : > { %833 = vmatpush.msra.mxu2 %v2510_v0  ;;  %941 = vmatpush.msra.mxu3 %v2845_v32 }
  0x89   : > { %688 = vmatpush.msra.mxu0 %v643_v5  ;;  %753 = vmatpush.msra.mxu1 %v659_v6 }
  0x8a   : > { %834 = vmatpush.msra.mxu2 %v805_v7  ;;  %942 = vmatpush.msra.mxu3 %v2836_v29 }
  0x8b   : > { %689 = vmatpush.msra.mxu0 %v642_v8  ;;  %754 = vmatpush.msra.mxu1 %v658_v11 }
  0x8c   : > { %690 = vmatmul.f32.vlgmr.msra.gmra.mxu0 %v2782_v9  ;;  %755 = vmatmul.f32.vlgmr.msra.gmra.mxu1 %v2784_v10 }
  0x8d   : > { %835 = vmatpush.msra.mxu2 %v804_v12  ;;  %998 = vmatpush.msrb.mxu0 %v2874_v46 }
  0x8e   : > { %836 = vmatmul.f32.vlgmr.msra.gmra.mxu2 %v2786_v13  ;;  %1079 = vmatpush.msrb.mxu1 %v2880_v48 }
  0x8f   : > { %999 = vmatpush.msrb.mxu0 %v2876_v47  ;;  %943 = vmatpush.msra.mxu3 %v2827_v26 }
  0x90   : > { %1080 = vmatpush.msrb.mxu1 %v2882_v49 }
  0x91   : > { %1000 = vmatpush.msrb.mxu0 %v534_v52  ;;  %944 = vmatpush.msra.mxu3 %v2818_v23 }
  0x92   : > { %1081 = vmatpush.msrb.mxu1 %v550_v55 }
  0x93   : > { %1001 = vmatpush.msrb.mxu0 %v533_v54  ;;  %945 = vmatpush.msra.mxu3 %v2809_v20 }
  0x94   : > { %693 = vmatmul.f32.gmra.mxu0 %v2791_v14  ;;  %758 = vmatmul.f32.gmra.mxu1 %v2793_v15 }
  0x95   : > { %1002 = vmatpush.msrb.mxu0 %v532_v56  ;;  %1082 = vmatpush.msrb.mxu1 %v549_v57 }
  0x96   : > { %839 = vmatmul.f32.gmra.mxu2 %v2795_v16  ;;  %946 = vmatpush.msra.mxu3 %v2800_v17 }
  0x97   : > { %1003 = vmatpush.msrb.mxu0 %v531_v51  ;;  %1083 = vmatpush.msrb.mxu1 %v548_v58 }
  0x98   : > { %947 = vmatpush.msra.mxu3 %v2791_v14 }
  0x99   : > { %1004 = vmatpush.msrb.mxu0 %v530_v42  ;;  %1084 = vmatpush.msrb.mxu1 %v547_v53 }
  0x9a   : > { %948 = vmatpush.msra.mxu3 %v2782_v9 }
  0x9b   : > { %1005 = vmatpush.msrb.mxu0 %v529_v36  ;;  %1085 = vmatpush.msrb.mxu1 %v546_v43 }
  0x9c   : > { %696 = vmatmul.f32.gmra.mxu0 %v2800_v17  ;;  %761 = vmatmul.f32.gmra.mxu1 %v2802_v18 }
  0x9d   : > { %1006 = vmatpush.msrb.mxu0 %v2847_v33  ;;  %1086 = vmatpush.msrb.mxu1 %v545_v37 }
  0x9e   : > { %842 = vmatmul.f32.gmra.mxu2 %v2804_v19 }
  0x9f   : > { %1007 = vmatpush.msrb.mxu0 %v2838_v30  ;;  %1087 = vmatpush.msrb.mxu1 %v2849_v34 }
  0xa1   : > { %1008 = vmatpush.msrb.mxu0 %v2829_v27  ;;  %1088 = vmatpush.msrb.mxu1 %v2840_v31 }
  0xa3   : > { %1009 = vmatpush.msrb.mxu0 %v2820_v24  ;;  %1089 = vmatpush.msrb.mxu1 %v2831_v28 }
  0xa4   : > { %699 = vmatmul.f32.gmra.mxu0 %v2809_v20  ;;  %764 = vmatmul.f32.gmra.mxu1 %v2811_v21 }
  0xa5   : > { %1010 = vmatpush.msrb.mxu0 %v2811_v21  ;;  %1090 = vmatpush.msrb.mxu1 %v2822_v25 }
  0xa6   : > { %845 = vmatmul.f32.gmra.mxu2 %v2813_v22 }
  0xa7   : > { %1011 = vmatpush.msrb.mxu0 %v2802_v18  ;;  %1091 = vmatpush.msrb.mxu1 %v2813_v22 }
  0xa9   : > { %1012 = vmatpush.msrb.mxu0 %v2793_v15  ;;  %1092 = vmatpush.msrb.mxu1 %v2804_v19 }
  0xab   : > { %1013 = vmatpush.msrb.mxu0 %v2784_v10  ;;  %1093 = vmatpush.msrb.mxu1 %v2795_v16 }
  0xac   : > { %702 = vmatmul.f32.gmra.mxu0 %v2818_v23  ;;  %767 = vmatmul.f32.gmra.mxu1 %v2820_v24 }
  0xad   : > { %1094 = vmatpush.msrb.mxu1 %v2786_v13 }
  0xae   : > { %848 = vmatmul.f32.gmra.mxu2 %v2822_v25 }
  0xaf   : > { %1547 = vmatpush.msra.mxu1 %v2857_v38 }
  0xb1   : > { %1548 = vmatpush.msra.mxu1 %v2860_v39 }
  0xb3   : > { %1549 = vmatpush.msra.mxu1 %v2862_v40 }
  0xb4   : > { %705 = vmatmul.f32.gmra.mxu0 %v2827_v26  ;;  %770 = vmatmul.f32.gmra.mxu1 %v2829_v27 }
  0xb5   : > { %1550 = vmatpush.msra.mxu1 %v2869_v44 }
  0xb6   : > { %851 = vmatmul.f32.gmra.mxu2 %v2831_v28 }
  0xb7   : > { %1551 = vmatpush.msra.mxu1 %v2872_v45 }
  0xb9   : > { %1552 = vmatpush.msra.mxu1 %v2884_v50 }
  0xbb   : > { %1553 = vmatpush.msra.mxu1 %v2864_v41 }
  0xbc   : > { %708 = vmatmul.f32.gmra.mxu0 %v2836_v29  ;;  %773 = vmatmul.f32.gmra.mxu1 %v2838_v30 }
  0xbd   : > { %1554 = vmatpush.msra.mxu1 %v2854_v35 }
  0xbe   : > { %854 = vmatmul.f32.gmra.mxu2 %v2840_v31 }
  0xbf   : > { %1555 = vmatpush.msra.mxu1 %v2845_v32 }
  0xc1   : > { %1556 = vmatpush.msra.mxu1 %v2836_v29 }
  0xc3   : > { %1557 = vmatpush.msra.mxu1 %v2827_v26 }
  0xc4   : > { %711 = vmatmul.f32.gmra.mxu0 %v2845_v32  ;;  %776 = vmatmul.f32.gmra.mxu1 %v2847_v33 }
  0xc5   : > { %1558 = vmatpush.msra.mxu1 %v2818_v23 }
  0xc6   : > { %857 = vmatmul.f32.gmra.mxu2 %v2849_v34 }
  0xc7   : > { %1559 = vmatpush.msra.mxu1 %v2809_v20 }
  0xc9   : > { %1560 = vmatpush.msra.mxu1 %v2800_v17 }
  0xcb   : > { %1561 = vmatpush.msra.mxu1 %v2791_v14 }
  0xcc   : > { %714 = vmatmul.f32.gmra.mxu0 %v2854_v35  ;;  %779 = vmatmul.f32.gmra.mxu1 %v529_v36 }
  0xcd   : > { %1562 = vmatpush.msra.mxu1 %v2782_v9 }
  0xce   : > { %860 = vmatmul.f32.gmra.mxu2 %v545_v37 }
  0xd4   : > { %717 = vmatmul.f32.gmra.mxu0 %v2864_v41  ;;  %782 = vmatmul.f32.gmra.mxu1 %v530_v42 }
  0xd6   : > { %863 = vmatmul.f32.gmra.mxu2 %v546_v43 }
  0xdc   : > { %720 = vmatmul.f32.gmra.mxu0 %v2884_v50  ;;  %785 = vmatmul.f32.gmra.mxu1 %v531_v51 }
  0xde   : > { %866 = vmatmul.f32.gmra.mxu2 %v547_v53 }
  0xe4   : > { %723 = vmatmul.f32.gmra.mxu0 %v2872_v45  ;;  %788 = vmatmul.f32.gmra.mxu1 %v532_v56 }
  0xe6   : > { %869 = vmatmul.f32.gmra.mxu2 %v548_v58 }
  0xec   : > { %726 = vmatmul.f32.gmra.mxu0 %v2869_v44  ;;  %791 = vmatmul.f32.gmra.mxu1 %v533_v54 }
  0xee   : > { %872 = vmatmul.f32.gmra.mxu2 %v549_v57 }
  0xf4   : > { %729 = vmatmul.f32.gmra.mxu0 %v2862_v40  ;;  %794 = vmatmul.f32.gmra.mxu1 %v534_v52 }
  0xf6   : > { %875 = vmatmul.f32.gmra.mxu2 %v550_v55 }
  0xfc   : > { %732 = vmatmul.f32.gmra.mxu0 %v2860_v39  ;;  %797 = vmatmul.f32.gmra.mxu1 %v2876_v47 }
  0xfe   : > { %878 = vmatmul.f32.gmra.mxu2 %v2882_v49 }
 0x104   : > { %735 = vmatmul.f32.gmra.mxu0 %v2857_v38  ;;  %800 = vmatmul.f32.gmra.mxu1 %v2874_v46 }
 0x106   : > { %881 = vmatmul.f32.gmra.mxu2 %v2880_v48 }
 0x109   : > { %v691_v59 = vpop.f32.mrf.mxu0  ;;  %v756_v60 = vpop.f32.mrf.mxu1 }
 0x10a   : > { %v885_v61 = vsub.f32 %v691_v59, %v756_v60 }
 0x10c   : > { %949 = vmatmul.f32.vlgmr.msra.gmra.mxu3 %v885_v61 }
 0x111   : > { %v837_v62 = vpop.f32.mrf.mxu2  ;;  %v694_v63 = vpop.f32.mrf.mxu0 }
 0x112   : > { %v901_v0 = vsub.f32 %v837_v62, %v691_v59  ;;  %v759_v1 = vpop.f32.mrf.mxu1 }
 0x113   : > { %v886_v2 = vsub.f32 %v694_v63, %v759_v1 }
 0x114   : > { %v917_v3 = vsub.f32 %v901_v0, %v756_v60 }
 0x115   : > { %952 = vmatmul.f32.gmra.mxu3 %v886_v2 }
 0x116   : > { %1014 = vmatmul.f32.vlgmr.msrb.gmra.mxu0 %v917_v3  ;;  %v1063_v4 = vadd.f32 %v917_v3, %v885_v61 }
 0x118   : > { %1095 = vmatmul.f32.vlgmr.msrb.gmra.mxu1 %v1063_v4 }
 0x119   : > { %v840_v5 = vpop.f32.mrf.mxu2  ;;  %v697_v6 = vpop.f32.mrf.mxu0 }
 0x11a   : > { %v902_v7 = vsub.f32 %v840_v5, %v694_v63  ;;  %v762_v8 = vpop.f32.mrf.mxu1 }
 0x11b   : > { %v887_v10 = vsub.f32 %v697_v6, %v762_v8 }
 0x11c   : > { %v918_v11 = vsub.f32 %v902_v7, %v759_v1 }
 0x11d   : > { %955 = vmatmul.f32.gmra.mxu3 %v887_v10 }
 0x11e   : > { %1017 = vmatmul.f32.gmra.mxu0 %v918_v11  ;;  %v1064_v12 = vadd.f32 %v918_v11, %v886_v2 }
 0x120   : > { %1098 = vmatmul.f32.gmra.mxu1 %v1064_v12 }
 0x121   : > { %v843_v13 = vpop.f32.mrf.mxu2  ;;  %v700_v15 = vpop.f32.mrf.mxu0 }
 0x122   : > { %v903_v16 = vsub.f32 %v843_v13, %v697_v6  ;;  %v765_v17 = vpop.f32.mrf.mxu1 }
 0x123   : > { %v888_v18 = vsub.f32 %v700_v15, %v765_v17 }
 0x124   : > { %v919_v19 = vsub.f32 %v903_v16, %v762_v8 }
 0x125   : > { %958 = vmatmul.f32.gmra.mxu3 %v888_v18 }
 0x126   : > { %1020 = vmatmul.f32.gmra.mxu0 %v919_v19  ;;  %v1065_v14 = vadd.f32 %v919_v19, %v887_v10 }
 0x128   : > { %1101 = vmatmul.f32.gmra.mxu1 %v1065_v14 }
 0x129   : > { %v846_v20 = vpop.f32.mrf.mxu2  ;;  %v703_v9 = vpop.f32.mrf.mxu0 }
 0x12a   : > { %v904_v21 = vsub.f32 %v846_v20, %v700_v15  ;;  %v768_v22 = vpop.f32.mrf.mxu1 }
 0x12b   : > { %v889_v23 = vsub.f32 %v703_v9, %v768_v22 }
 0x12c   : > { %v920_v24 = vsub.f32 %v904_v21, %v765_v17 }
 0x12d   : > { %961 = vmatmul.f32.gmra.mxu3 %v889_v23 }
 0x12e   : > { %1023 = vmatmul.f32.gmra.mxu0 %v920_v24  ;;  %v1066_v25 = vadd.f32 %v920_v24, %v888_v18 }
 0x130   : > { %1104 = vmatmul.f32.gmra.mxu1 %v1066_v25 }
 0x131   : > { %v849_v26 = vpop.f32.mrf.mxu2  ;;  %v706_v27 = vpop.f32.mrf.mxu0 }
 0x132   : > { %v905_v28 = vsub.f32 %v849_v26, %v703_v9  ;;  %v771_v29 = vpop.f32.mrf.mxu1 }
 0x133   : > { %v890_v30 = vsub.f32 %v706_v27, %v771_v29 }
 0x134   : > { %v921_v31 = vsub.f32 %v905_v28, %v768_v22 }
 0x135   : > { %964 = vmatmul.f32.gmra.mxu3 %v890_v30 }
 0x136   : > { %1026 = vmatmul.f32.gmra.mxu0 %v921_v31  ;;  %v1067_v32 = vadd.f32 %v921_v31, %v889_v23 }
 0x138   : > { %1107 = vmatmul.f32.gmra.mxu1 %v1067_v32 }
 0x139   : > { %v852_v33 = vpop.f32.mrf.mxu2  ;;  %v709_v34 = vpop.f32.mrf.mxu0 }
 0x13a   : > { %v906_v35 = vsub.f32 %v852_v33, %v706_v27  ;;  %v774_v36 = vpop.f32.mrf.mxu1 }
 0x13b   : > { %v891_v37 = vsub.f32 %v709_v34, %v774_v36 }
 0x13c   : > { %v922_v38 = vsub.f32 %v906_v35, %v771_v29 }
 0x13d   : > { %967 = vmatmul.f32.gmra.mxu3 %v891_v37 }
 0x13e   : > { %1029 = vmatmul.f32.gmra.mxu0 %v922_v38  ;;  %v1068_v39 = vadd.f32 %v922_v38, %v890_v30 }
 0x140   : > { %1110 = vmatmul.f32.gmra.mxu1 %v1068_v39 }
 0x141   : > { %v855_v40 = vpop.f32.mrf.mxu2  ;;  %v712_v41 = vpop.f32.mrf.mxu0 }
 0x142   : > { %v907_v42 = vsub.f32 %v855_v40, %v709_v34  ;;  %v777_v43 = vpop.f32.mrf.mxu1 }
 0x143   : > { %v892_v44 = vsub.f32 %v712_v41, %v777_v43 }
 0x144   : > { %v923_v45 = vsub.f32 %v907_v42, %v774_v36 }
 0x145   : > { %970 = vmatmul.f32.gmra.mxu3 %v892_v44 }
 0x146   : > { %1032 = vmatmul.f32.gmra.mxu0 %v923_v45  ;;  %v1069_v46 = vadd.f32 %v923_v45, %v891_v37 }
 0x148   : > { %1113 = vmatmul.f32.gmra.mxu1 %v1069_v46 }
 0x149   : > { %v858_v47 = vpop.f32.mrf.mxu2  ;;  %v715_v48 = vpop.f32.mrf.mxu0 }
 0x14a   : > { %v908_v49 = vsub.f32 %v858_v47, %v712_v41  ;;  %v780_v50 = vpop.f32.mrf.mxu1 }
 0x14b   : > { %v893_v51 = vsub.f32 %v715_v48, %v780_v50 }
 0x14c   : > { %v924_v52 = vsub.f32 %v908_v49, %v777_v43 }
 0x14d   : > { %973 = vmatmul.f32.gmra.mxu3 %v893_v51 }
 0x14e   : > { %1035 = vmatmul.f32.gmra.mxu0 %v924_v52  ;;  %v1070_v53 = vadd.f32 %v924_v52, %v892_v44 }
 0x150   : > { %1116 = vmatmul.f32.gmra.mxu1 %v1070_v53 }
 0x151   : > { %v861_v54 = vpop.f32.mrf.mxu2  ;;  %v718_v55 = vpop.f32.mrf.mxu0 }
 0x152   : > { %v909_v56 = vsub.f32 %v861_v54, %v715_v48  ;;  %v783_v57 = vpop.f32.mrf.mxu1 }
 0x153   : > { %v894_v58 = vsub.f32 %v718_v55, %v783_v57 }
 0x154   : > { %v925_v59 = vsub.f32 %v909_v56, %v780_v50 }
 0x155   : > { %976 = vmatmul.f32.gmra.mxu3 %v894_v58 }
 0x156   : > { %1038 = vmatmul.f32.gmra.mxu0 %v925_v59  ;;  %v1071_v60 = vadd.f32 %v925_v59, %v893_v51 }
 0x158   : > { %1119 = vmatmul.f32.gmra.mxu1 %v1071_v60 }
 0x159   : > { %v864_v61 = vpop.f32.mrf.mxu2  ;;  %v721_v62 = vpop.f32.mrf.mxu0 }
 0x15a   : > { %v910_v63 = vsub.f32 %v864_v61, %v718_v55  ;;  %v786_v0 = vpop.f32.mrf.mxu1 }
 0x15b   : > { %v895_v1 = vsub.f32 %v721_v62, %v786_v0 }
 0x15c   : > { %v926_v2 = vsub.f32 %v910_v63, %v783_v57 }
 0x15d   : > { %979 = vmatmul.f32.gmra.mxu3 %v895_v1 }
 0x15e   : > { %1041 = vmatmul.f32.gmra.mxu0 %v926_v2  ;;  %v1072_v3 = vadd.f32 %v926_v2, %v894_v58 }
 0x160   : > { %1122 = vmatmul.f32.gmra.mxu1 %v1072_v3 }
 0x161   : > { %v867_v4 = vpop.f32.mrf.mxu2  ;;  %v724_v5 = vpop.f32.mrf.mxu0 }
 0x162   : > { %v911_v6 = vsub.f32 %v867_v4, %v721_v62  ;;  %v789_v7 = vpop.f32.mrf.mxu1 }
 0x163   : > { %v896_v8 = vsub.f32 %v724_v5, %v789_v7 }
 0x164   : > { %v927_v10 = vsub.f32 %v911_v6, %v786_v0 }
 0x165   : > { %982 = vmatmul.f32.gmra.mxu3 %v896_v8 }
 0x166   : > { %1044 = vmatmul.f32.gmra.mxu0 %v927_v10  ;;  %v1073_v11 = vadd.f32 %v927_v10, %v895_v1  ;;  %v593_v10 = vld [vmem:[#allocation16 + $0x40] sm:$0xff] }
 0x168   : > { %1125 = vmatmul.f32.gmra.mxu1 %v1073_v11 }
 0x169   : > { %v870_v12 = vpop.f32.mrf.mxu2  ;;  %v727_v13 = vpop.f32.mrf.mxu0 }
 0x16a   : > { %v912_v15 = vsub.f32 %v870_v12, %v724_v5  ;;  %v792_v16 = vpop.f32.mrf.mxu1 }
 0x16b   : > { %v897_v17 = vsub.f32 %v727_v13, %v792_v16 }
 0x16c   : > { %v928_v18 = vsub.f32 %v912_v15, %v789_v7 }
 0x16d   : > { %985 = vmatmul.f32.gmra.mxu3 %v897_v17 }
 0x16e   : > { %1047 = vmatmul.f32.gmra.mxu0 %v928_v18  ;;  %v1074_v19 = vadd.f32 %v928_v18, %v896_v8  ;;  %v577_v8 = vld [vmem:[#allocation15 + $0x40] sm:$0xff] }
 0x170   : > { %1128 = vmatmul.f32.gmra.mxu1 %v1074_v19 }
 0x171   : > { %v873_v14 = vpop.f32.mrf.mxu2  ;;  %v730_v20 = vpop.f32.mrf.mxu0 }
 0x172   : > { %v913_v9 = vsub.f32 %v873_v14, %v727_v13  ;;  %v795_v21 = vpop.f32.mrf.mxu1 }
 0x173   : > { %v898_v22 = vsub.f32 %v730_v20, %v795_v21 }
 0x174   : > { %v929_v23 = vsub.f32 %v913_v9, %v792_v16 }
 0x175   : > { %988 = vmatmul.f32.gmra.mxu3 %v898_v22 }
 0x176   : > { %1050 = vmatmul.f32.gmra.mxu0 %v929_v23  ;;  %v1075_v24 = vadd.f32 %v929_v23, %v897_v17 }
 0x178   : > { %1131 = vmatmul.f32.gmra.mxu1 %v1075_v24 }
 0x179   : > { %v876_v25 = vpop.f32.mrf.mxu2  ;;  %v733_v26 = vpop.f32.mrf.mxu0 }
 0x17a   : > { %v914_v27 = vsub.f32 %v876_v25, %v730_v20  ;;  %v798_v28 = vpop.f32.mrf.mxu1 }
 0x17b   : > { %v899_v29 = vsub.f32 %v733_v26, %v798_v28 }
 0x17c   : > { %v930_v30 = vsub.f32 %v914_v27, %v795_v21 }
 0x17d   : > { %991 = vmatmul.f32.gmra.mxu3 %v899_v29 }
 0x17e   : > { %1053 = vmatmul.f32.gmra.mxu0 %v930_v30  ;;  %v1076_v31 = vadd.f32 %v930_v30, %v898_v22 }
 0x180   : > { %1134 = vmatmul.f32.gmra.mxu1 %v1076_v31 }
 0x181   : > { %v879_v32 = vpop.f32.mrf.mxu2  ;;  %v736_v33 = vpop.f32.mrf.mxu0 }
 0x182   : > { %v915_v34 = vsub.f32 %v879_v32, %v733_v26  ;;  %v801_v35 = vpop.f32.mrf.mxu1 }
 0x183   : > { %v900_v36 = vsub.f32 %v736_v33, %v801_v35 }
 0x184   : > { %v931_v37 = vsub.f32 %v915_v34, %v798_v28 }
 0x185   : > { %994 = vmatmul.f32.gmra.mxu3 %v900_v36 }
 0x186   : > { %1056 = vmatmul.f32.gmra.mxu0 %v931_v37  ;;  %v1077_v38 = vadd.f32 %v931_v37, %v899_v29 }
 0x188   : > { %1137 = vmatmul.f32.gmra.mxu1 %v1077_v38 }
 0x189   : > { %v882_v39 = vpop.f32.mrf.mxu2 }
 0x18a   : > { %v916_v40 = vsub.f32 %v882_v39, %v736_v33 }
 0x18c   : > { %v932_v41 = vsub.f32 %v916_v40, %v801_v35 }
 0x18e   : > { %1059 = vmatmul.f32.gmra.mxu0 %v932_v41  ;;  %v1078_v42 = vadd.f32 %v932_v41, %v900_v36 }
 0x18f   : > { %v2942_v43 = vpop.f32.mrf.mxu3 }
 0x190   : > { %1140 = vmatmul.f32.gmra.mxu1 %v1078_v42 }
 0x193   : > { %v1015_v44 = vpop.f32.mrf.mxu0 }
 0x194   : > { %v2987_v40 = vsub.f32 %v2942_v43, %v1015_v44 }
 0x195   : > { %v1096_v45 = vpop.f32.mrf.mxu1 }
 0x196   : > { %v1160_v35 = vsub.f32 %v1096_v45, %v2942_v43  ;;  %3232 = vst [vmem:[#allocation30_spill] sm:$0xff] %v2987_v40 }
 0x198   : > { %v2944_v46 = vpop.f32.mrf.mxu3  ;;  %v2989_v41 = vsub.f32 %v1160_v35, %v1015_v44  ;;  %v584_v35 = vld [vmem:[#allocation15 + $0x78] sm:$0xff] }
 0x19a   : > { %3233 = vst [vmem:[#allocation31_spill] sm:$0xff] %v2989_v41  ;;  %v596_v41 = vld [vmem:[#allocation16 + $0x58] sm:$0xff] }
 0x19b   : > { %v1018_v47 = vpop.f32.mrf.mxu0 }
 0x19d   : > { %v1099_v48 = vpop.f32.mrf.mxu1 }
 0x19e   : > { %v1161_v37 = vsub.f32 %v1099_v48, %v2944_v46 }
 0x1a0   : > { %v2946_v49 = vpop.f32.mrf.mxu3 }
 0x1a3   : > { %v1021_v50 = vpop.f32.mrf.mxu0 }
 0x1a4   : > { %v2998_v45 = vsub.f32 %v2946_v49, %v1021_v50 }
 0x1a5   : > { %v1102_v51 = vpop.f32.mrf.mxu1 }
 0x1a6   : > { %v1162_v38 = vsub.f32 %v1102_v51, %v2946_v49 }
 0x1a8   : > { %v2948_v52 = vpop.f32.mrf.mxu3  ;;  %v3000_v51 = vsub.f32 %v1162_v38, %v1021_v50 }
 0x1ab   : > { %v2950_v53 = vpop.f32.mrf.mxu0 }
 0x1ad   : > { %v1105_v54 = vpop.f32.mrf.mxu1 }
 0x1ae   : > { %v1163_v39 = vsub.f32 %v1105_v54, %v2948_v52 }
 0x1b0   : > { %v2952_v55 = vpop.f32.mrf.mxu3  ;;  %v3003_v54 = vsub.f32 %v1163_v39, %v2950_v53 }
 0x1b3   : > { %v2954_v56 = vpop.f32.mrf.mxu0 }
 0x1b5   : > { %v2956_v57 = vpop.f32.mrf.mxu1 }
 0x1b8   : > { %v2958_v58 = vpop.f32.mrf.mxu3 }
 0x1bb   : > { %v2960_v59 = vpop.f32.mrf.mxu0 }
 0x1bd   : > { %v2962_v60 = vpop.f32.mrf.mxu1 }
 0x1c0   : > { %v2964_v61 = vpop.f32.mrf.mxu3 }
 0x1c3   : > { %v2966_v62 = vpop.f32.mrf.mxu0 }
 0x1c5   : > { %v2968_v63 = vpop.f32.mrf.mxu1 }
 0x1c8   : > { %v2970_v0 = vpop.f32.mrf.mxu3 }
 0x1cb   : > { %v2972_v1 = vpop.f32.mrf.mxu0 }
 0x1cd   : > { %v1117_v2 = vpop.f32.mrf.mxu1 }
 0x1ce   : > { %v1167_v42 = vsub.f32 %v1117_v2, %v2970_v0  ;;  %v3007_v2 = vsub.f32 %v2952_v55, %v2954_v56 }
 0x1d0   : > { %v974_v3 = vpop.f32.mrf.mxu3 }
 0x1d3   : > { %v1039_v4 = vpop.f32.mrf.mxu0 }
 0x1d4   : > { %v1152_v6 = vsub.f32 %v974_v3, %v1039_v4 }
 0x1d5   : > { %v1120_v5 = vpop.f32.mrf.mxu1 }
 0x1d6   : > { %v1168_v7 = vsub.f32 %v1120_v5, %v974_v3  ;;  %v1200_v13 = vmul.f32 %v1152_v6, %v577_v8  ;;  %v1248_v16 = vmul.f32 %v1152_v6, %v593_v10  ;;  %v2995_v5 = vsub.f32 %v1161_v37, %v1018_v47 }
 0x1d8   : > { %v1184_v11 = vsub.f32 %v1168_v7, %v1039_v4  ;;  %v977_v12 = vpop.f32.mrf.mxu3  ;;  %v2993_v4 = vsub.f32 %v2944_v46, %v1018_v47  ;;  %v583_v46 = vld [vmem:[#allocation15 + $0x70] sm:$0xff] }
 0x1da   : > { %v1216_v15 = vmul.f32 %v1184_v11, %v593_v10  ;;  %v1264_v17 = vmul.f32 %v1184_v11, %v577_v8  ;;  %v3016_v10 = vsub.f32 %v1167_v42, %v2972_v1 }
 0x1db   : > { %v1042_v18 = vpop.f32.mrf.mxu0 }
 0x1dc   : > { %v2974_v19 = vsub.f32 %v1200_v13, %v1216_v15  ;;  %v2976_v14 = vadd.f32 %v1264_v17, %v1248_v16  ;;  %v3018_v15 = vsub.f32 %v977_v12, %v1042_v18 }
 0x1dd   : > { %v1123_v20 = vpop.f32.mrf.mxu1 }
 0x1de   : > { %v2980_v9 = vadd.f32 %v2976_v14, %v2974_v19  ;;  %v1169_v48 = vsub.f32 %v1123_v20, %v977_v12 }
 0x1e0   : > { %v980_v21 = vpop.f32.mrf.mxu3  ;;  %v3020_v16 = vsub.f32 %v1169_v48, %v1042_v18 }
 0x1e3   : > { %v1045_v22 = vpop.f32.mrf.mxu0 }
 0x1e5   : > { %v1126_v23 = vpop.f32.mrf.mxu1 }
 0x1e6   : > { %v1170_v43 = vsub.f32 %v1126_v23, %v980_v21  ;;  %v3022_v23 = vsub.f32 %v980_v21, %v1045_v22 }
 0x1e8   : > { %v983_v24 = vpop.f32.mrf.mxu3 }
 0x1eb   : > { %v1048_v25 = vpop.f32.mrf.mxu0 }
 0x1ec   : > { %v1155_v37 = vsub.f32 %v983_v24, %v1048_v25 }
 0x1ed   : > { %v1129_v26 = vpop.f32.mrf.mxu1 }
 0x1ee   : > { %v1171_v47 = vsub.f32 %v1129_v26, %v983_v24  ;;  %v1186_v26 = vsub.f32 %v1170_v43, %v1045_v22  ;;  %v598_v22 = vld [vmem:[#allocation16 + $0x68] sm:$0xff]  ;;  %v581_v24 = vld [vmem:[#allocation15 + $0x60] sm:$0xff] }
 0x1f0   : > { %v986_v27 = vpop.f32.mrf.mxu3  ;;  %v1187_v38 = vsub.f32 %v1171_v47, %v1048_v25  ;;  %v597_v25 = vld [vmem:[#allocation16 + $0x60] sm:$0xff] }
 0x1f3   : > { %v1051_v28 = vpop.f32.mrf.mxu0 }
 0x1f4   : > { %v1156_v50 = vsub.f32 %v986_v27, %v1051_v28 }
 0x1f5   : > { %v1132_v29 = vpop.f32.mrf.mxu1 }
 0x1f6   : > { %v1172_v49 = vsub.f32 %v1132_v29, %v986_v27 }
 0x1f8   : > { %v989_v30 = vpop.f32.mrf.mxu3  ;;  %v1188_v39 = vsub.f32 %v1172_v49, %v1051_v28 }
 0x1fa   : > { %v1220_v49 = vmul.f32 %v1188_v39, %v597_v25 }
 0x1fb   : > { %v1054_v31 = vpop.f32.mrf.mxu0 }
 0x1fc   : > { %v1157_v12 = vsub.f32 %v989_v30, %v1054_v31 }
 0x1fd   : > { %v1135_v32 = vpop.f32.mrf.mxu1 }
 0x1fe   : > { %v1173_v44 = vsub.f32 %v1135_v32, %v989_v30 }
 0x200   : > { %v992_v33 = vpop.f32.mrf.mxu3  ;;  %v1189_v29 = vsub.f32 %v1173_v44, %v1054_v31  ;;  %v1253_v31 = vmul.f32 %v1157_v12, %v598_v22 }
 0x203   : > { %v1057_v34 = vpop.f32.mrf.mxu0 }
 0x204   : > { %v1158_v32 = vsub.f32 %v992_v33, %v1057_v34 }
 0x205   : > { %v1138_v36 = vpop.f32.mrf.mxu1 }
 0x206   : > { %v1174_v3 = vsub.f32 %v1138_v36, %v992_v33  ;;  %v600_v36 = vld [vmem:[#allocation16 + $0x78] sm:$0xff]  ;;  %v1206_v43 = vmul.f32 %v1158_v32, %v583_v46 }
 0x208   : > { %v995_v6 = vpop.f32.mrf.mxu3  ;;  %v1190_v11 = vsub.f32 %v1174_v3, %v1057_v34  ;;  %v599_v3 = vld [vmem:[#allocation16 + $0x70] sm:$0xff]  ;;  %v1221_v34 = vmul.f32 %v1189_v29, %v598_v22  ;;  %v594_v22 = vld [vmem:[#allocation16 + $0x48] sm:$0xff] }
 0x209   : > { %v1254_v33 = vmul.f32 %v1158_v32, %v599_v3 }
 0x20a   : > { %v1222_v8 = vmul.f32 %v1190_v11, %v599_v3  ;;  %v1270_v18 = vmul.f32 %v1190_v11, %v583_v46  ;;  %v580_v11 = vld [vmem:[#allocation15 + $0x58] sm:$0xff]  ;;  %v579_v3 = vld [vmem:[#allocation15 + $0x50] sm:$0xff] }
 0x20b   : > { %v1060_v7 = vpop.f32.mrf.mxu0  ;;  %v1267_v46 = vmul.f32 %v1187_v38, %v580_v11 }
 0x20c   : > { %v1159_v17 = vsub.f32 %v995_v6, %v1060_v7  ;;  %v1238_v27 = vsub.f32 %v1206_v43, %v1222_v8  ;;  %v1286_v28 = vadd.f32 %v1270_v18, %v1254_v33  ;;  %v1266_v18 = vmul.f32 %v1186_v26, %v579_v3 }
 0x20d   : > { %v1141_v13 = vpop.f32.mrf.mxu1 }
 0x20e   : > { %v1175_v20 = vsub.f32 %v1141_v13, %v995_v6  ;;  %v1207_v48 = vmul.f32 %v1159_v17, %v584_v35  ;;  %v1255_v6 = vmul.f32 %v1159_v17, %v600_v36  ;;  %v582_v13 = vld [vmem:[#allocation15 + $0x68] sm:$0xff] }
 0x20f   : > { %v1269_v44 = vmul.f32 %v1189_v29, %v582_v13  ;;  %v1205_v30 = vmul.f32 %v1157_v12, %v582_v13  ;;  %v1204_v29 = vmul.f32 %v1156_v50, %v581_v24  ;;  %v578_v13 = vld [vmem:[#allocation15 + $0x48] sm:$0xff] }
 0x210   : > { %v1191_v42 = vsub.f32 %v1175_v20, %v1060_v7  ;;  %v1268_v20 = vmul.f32 %v1188_v39, %v581_v24  ;;  %v1203_v39 = vmul.f32 %v1155_v37, %v580_v11  ;;  %v1265_v43 = vmul.f32 %v3020_v16, %v578_v13  ;;  %v575_v11 = vld [vmem:[#allocation15 + $0x30] sm:$0xff] }
 0x211   : > { %v1237_v32 = vsub.f32 %v1205_v30, %v1221_v34  ;;  %v1236_v12 = vsub.f32 %v1204_v29, %v1220_v49  ;;  %v1151_v24 = vsub.f32 %v2970_v0, %v2972_v1  ;;  %v1249_v49 = vmul.f32 %v3018_v15, %v594_v22  ;;  %v576_v0 = vld [vmem:[#allocation15 + $0x38] sm:$0xff] }
 0x212   : > { %v1223_v40 = vmul.f32 %v1191_v42, %v600_v36  ;;  %v1271_v21 = vmul.f32 %v1191_v42, %v584_v35  ;;  %v1219_v35 = vmul.f32 %v1187_v38, %v596_v41  ;;  %v1285_v36 = vadd.f32 %v1269_v44, %v1253_v31 }
 0x213   : > { %v1252_v42 = vmul.f32 %v1156_v50, %v597_v25  ;;  %v1202_v38 = vmul.f32 %v3022_v23, %v579_v3  ;;  %v1217_v50 = vmul.f32 %v3020_v16, %v594_v22  ;;  %v1201_v25 = vmul.f32 %v3018_v15, %v578_v13 }
 0x214   : > { %v1239_v47 = vsub.f32 %v1207_v48, %v1223_v40  ;;  %v1287_v7 = vadd.f32 %v1271_v21, %v1255_v6  ;;  %v595_v40 = vld [vmem:[#allocation16 + $0x50] sm:$0xff]  ;;  %v1432_v48 = vadd.f32 %v1286_v28, %v1238_v27  ;;  %v1251_v21 = vmul.f32 %v1155_v37, %v596_v41 }
 0x215   : > { %v1218_v8 = vmul.f32 %v1186_v26, %v595_v40  ;;  %v1284_v6 = vadd.f32 %v1268_v20, %v1252_v42  ;;  %v1431_v33 = vadd.f32 %v1285_v36, %v1237_v32  ;;  %v1235_v34 = vsub.f32 %v1203_v39, %v1219_v35  ;;  %v592_v20 = vld [vmem:[#allocation16 + $0x38] sm:$0xff]  ;;  %v574_v42 = vld [vmem:[#allocation15 + $0x28] sm:$0xff] }
 0x216   : > { %1288 = vmatpush.msrb.mxu2 %v1239_v47  ;;  %1353 = vmatpush.msrb.mxu3 %v1287_v7  ;;  %v1433_v17 = vadd.f32 %v1287_v7, %v1239_v47  ;;  %v1283_v44 = vadd.f32 %v1267_v46, %v1251_v21  ;;  %v1250_v26 = vmul.f32 %v3022_v23, %v595_v40 }
 0x217   : > { %v3234_v41 = vsub.f32 %v2968_v63, %v2964_v61  ;;  %v1430_v47 = vadd.f32 %v1284_v6, %v1236_v12  ;;  %v1234_v16 = vsub.f32 %v1202_v38, %v1218_v8  ;;  %v3235_v23 = vsub.f32 %v2962_v60, %v2958_v58  ;;  %v589_v8 = vld [vmem:[#allocation16 + $0x20] sm:$0xff]  ;;  %v572_v38 = vld [vmem:[#allocation15 + $0x18] sm:$0xff] }
 0x218   : > { %1289 = vmatpush.msrb.mxu2 %v1238_v27  ;;  %1354 = vmatpush.msrb.mxu3 %v1286_v28  ;;  %v1282_v7 = vadd.f32 %v1266_v18, %v1250_v26  ;;  %v1150_v27 = vsub.f32 %v2964_v61, %v2966_v62  ;;  %v1215_v1 = vmul.f32 %v3016_v10, %v592_v20  ;;  %v587_v26 = vld [vmem:[#allocation16 + $0x10] sm:$0xff] }
 0x219   : > { %1434 = vmatpush.msra.mxu0 %v1433_v17  ;;  %v1182_v37 = vsub.f32 %v3234_v41, %v2966_v62  ;;  %v1181_v63 = vsub.f32 %v3235_v23, %v2960_v59  ;;  %v1429_v28 = vadd.f32 %v1283_v44, %v1235_v34  ;;  %v1233_v30 = vsub.f32 %v1201_v25, %v1217_v50  ;;  %v591_v17 = vld [vmem:[#allocation16 + $0x30] sm:$0xff]  ;;  %v588_v50 = vld [vmem:[#allocation16 + $0x18] sm:$0xff] }
 0x21a   : > { %1290 = vmatpush.msrb.mxu2 %v1237_v32  ;;  %1355 = vmatpush.msrb.mxu3 %v1285_v36  ;;  %v1281_v31 = vadd.f32 %v1265_v43, %v1249_v49  ;;  %v1263_v15 = vmul.f32 %v3016_v10, %v576_v0  ;;  %v3236_v60 = vsub.f32 %v2956_v57, %v2952_v55  ;;  %v590_v10 = vld [vmem:[#allocation16 + $0x28] sm:$0xff] }
 0x21b   : > { %1435 = vmatpush.msra.mxu0 %v1432_v48  ;;  %v1149_v61 = vsub.f32 %v2958_v58, %v2960_v59  ;;  %v1214_v62 = vmul.f32 %v1182_v37, %v591_v17  ;;  %v1428_v46 = vadd.f32 %v1282_v7, %v1234_v16  ;;  %v1199_v32 = vmul.f32 %v1151_v24, %v576_v0  ;;  %v573_v59 = vld [vmem:[#allocation15 + $0x20] sm:$0xff] }
 0x21c   : > { %1291 = vmatpush.msrb.mxu2 %v1236_v12  ;;  %1356 = vmatpush.msrb.mxu3 %v1284_v6  ;;  %v1180_v35 = vsub.f32 %v3236_v60, %v2954_v56  ;;  %v1247_v36 = vmul.f32 %v1151_v24, %v592_v20  ;;  %v1262_v29 = vmul.f32 %v1182_v37, %v575_v11  ;;  %v569_v0 = vld [vmem:[#allocation15] sm:$0xff] }
 0x21d   : > { %1436 = vmatpush.msra.mxu0 %v1431_v33  ;;  %v1198_v3 = vmul.f32 %v1150_v27, %v575_v11  ;;  %v1213_v40 = vmul.f32 %v1181_v63, %v590_v10  ;;  %v1261_v39 = vmul.f32 %v1181_v63, %v574_v42  ;;  %v1427_v55 = vadd.f32 %v1281_v31, %v1233_v30 }
 0x21e   : > { %1292 = vmatpush.msrb.mxu2 %v1235_v34  ;;  %1357 = vmatpush.msrb.mxu3 %v1283_v44  ;;  %v1231_v56 = vsub.f32 %v1199_v32, %v1215_v1  ;;  %v1279_v57 = vadd.f32 %v1263_v15, %v1247_v36  ;;  %v1246_v58 = vmul.f32 %v1150_v27, %v591_v17  ;;  %v571_v44 = vld [vmem:[#allocation15 + $0x10] sm:$0xff]  ;;  %v585_v1 = vld [vmem:[#allocation16] sm:$0xff] }
 0x21f   : > { %1437 = vmatpush.msra.mxu0 %v1430_v47  ;;  %v1147_v18 = vsub.f32 %v2948_v52, %v2950_v53  ;;  %v1212_v48 = vmul.f32 %v1180_v35, %v589_v8  ;;  %v1260_v12 = vmul.f32 %v1180_v35, %v573_v59  ;;  %v1230_v6 = vsub.f32 %v1198_v3, %v1214_v62  ;;  %v3238_v35 = vld [vmem:[#allocation30_spill] sm:$0xff] }
 0x220   : > { %1293 = vmatpush.msrb.mxu2 %v1234_v16  ;;  %1358 = vmatpush.msrb.mxu3 %v1282_v7  ;;  %v1278_v21 = vadd.f32 %v1262_v29, %v1246_v58  ;;  %v1197_v13 = vmul.f32 %v1149_v61, %v574_v42  ;;  %v1245_v22 = vmul.f32 %v1149_v61, %v590_v10  ;;  %v570_v7 = vld [vmem:[#allocation15 + $0x8] sm:$0xff]  ;;  %v3082_v58 = vld [vmem:[#allocation10 + $0x70] sm:$0xff] }
 0x221   : > { %1438 = vmatpush.msra.mxu0 %v1429_v28  ;;  %v1196_v43 = vmul.f32 %v3007_v2, %v573_v59  ;;  %v1211_v33 = vmul.f32 %v3003_v54, %v588_v50  ;;  %v1259_v52 = vmul.f32 %v3003_v54, %v572_v38  ;;  %v1425_v53 = vadd.f32 %v1279_v57, %v1231_v56  ;;  %v3085_v59 = vld [vmem:[#allocation13 + $0x68] sm:$0xff] }
 0x222   : > { %1294 = vmatpush.msrb.mxu2 %v1233_v30  ;;  %1359 = vmatpush.msrb.mxu3 %v1281_v31  ;;  %v1244_v34 = vmul.f32 %v3007_v2, %v589_v8  ;;  %v1195_v41 = vmul.f32 %v1147_v18, %v572_v38  ;;  %v1210_v37 = vmul.f32 %v3000_v51, %v587_v26  ;;  %v3237_v30 = vld [vmem:[#allocation31_spill] sm:$0xff]  ;;  %v3107_v38 = vld [vmem:[#allocation10 + $0x50] sm:$0xff] }
 0x223   : > { %1439 = vmatpush.msra.mxu0 %v1428_v46  ;;  %v1258_v24 = vmul.f32 %v3000_v51, %v571_v44  ;;  %v1424_v25 = vadd.f32 %v1278_v21, %v1230_v6  ;;  %v1228_v47 = vsub.f32 %v1196_v43, %v1212_v48  ;;  %v1243_v16 = vmul.f32 %v1147_v18, %v588_v50  ;;  %v3088_v8 = vld [vmem:[#allocation10 + $0x68] sm:$0xff]  ;;  %v3092_v18 = vld [vmem:[#allocation10 + $0x60] sm:$0xff] }
 0x224   : > { %1295 = vmatpush.msrb.mxu2 %v2974_v19  ;;  %1360 = vmatpush.msrb.mxu3 %v2976_v14  ;;  %v1229_v19 = vsub.f32 %v1197_v13, %v1213_v40  ;;  %v1277_v14 = vadd.f32 %v1261_v39, %v1245_v22  ;;  %v1276_v54 = vadd.f32 %v1260_v12, %v1244_v34  ;;  %v2110_v40 = vld [vmem:[#allocation9] sm:$0xff]  ;;  %v2116_v12 = vld [vmem:[#allocation9 + $0x8] sm:$0xff]  ;;  %v3100_v13 = vld [vmem:[#allocation10 + $0x58] sm:$0xff] }
 0x225   : > { %1440 = vmatpush.msra.mxu0 %v1427_v55  ;;  %v1194_v2 = vmul.f32 %v2998_v45, %v571_v44  ;;  %v1257_v20 = vmul.f32 %v2995_v5, %v570_v7  ;;  %v1227_v63 = vsub.f32 %v1195_v41, %v1211_v33  ;;  %v1275_v27 = vadd.f32 %v1259_v52, %v1243_v16  ;;  %v3073_v39 = vld [vmem:[#allocation13] sm:$0xff]  ;;  %v3103_v22 = vld [vmem:[#allocation13 + $0x58] sm:$0xff]  ;;  %v3110_v50 = vld [vmem:[#allocation10 + $0x48] sm:$0xff] }
 0x226   : > { %1296 = vmatpush.msrb.mxu2 %v1231_v56  ;;  %1361 = vmatpush.msrb.mxu3 %v1279_v57  ;;  %v1423_v23 = vadd.f32 %v1277_v14, %v1229_v19  ;;  %v1242_v51 = vmul.f32 %v2998_v45, %v587_v26  ;;  %v1193_v28 = vmul.f32 %v2993_v4, %v570_v7  ;;  %v2111_v55 = vld [vmem:[#allocation10] sm:$0xff]  ;;  %v3075_v56 = vld [vmem:[#allocation10 + $0x78] sm:$0xff]  ;;  %v3078_v57 = vld [vmem:[#allocation13 + $0x70] sm:$0xff] }
 0x227   : > { %1441 = vmatpush.msra.mxu0 %v2980_v9  ;;  %v586_v9 = vld [vmem:[#allocation16 + $0x8] sm:$0xff]  ;;  %v1208_v31 = vmul.f32 %v3237_v30, %v585_v1  ;;  %v1256_v15 = vmul.f32 %v3237_v30, %v569_v0  ;;  %v1422_v11 = vadd.f32 %v1276_v54, %v1228_v47  ;;  %v1226_v17 = vsub.f32 %v1194_v2, %v1210_v37  ;;  %v3095_v48 = vld [vmem:[#allocation13 + $0x60] sm:$0xff]  ;;  %v2122_v33 = vld [vmem:[#allocation9 + $0x10] sm:$0xff] }
 0x228   : > { %1297 = vmatpush.msrb.mxu2 %v1230_v6  ;;  %1362 = vmatpush.msrb.mxu3 %v1278_v21  ;;  %v1209_v49 = vmul.f32 %v2995_v5, %v586_v9  ;;  %v1274_v5 = vadd.f32 %v1258_v24, %v1242_v51  ;;  %v1241_v60 = vmul.f32 %v2993_v4, %v586_v9  ;;  %v3071_v4 = vld [vmem:[#allocation13 + $0x78] sm:$0xff]  ;;  %v3097_v6 = vld [vmem:[#allocation13 + $0x8] sm:$0xff]  ;;  %v2121_v43 = vld [vmem:[#allocation10 + $0x40] sm:$0xff] }
 0x229   : > { %1442 = vmatpush.msra.mxu0 %v1425_v53  ;;  %v1192_v45 = vmul.f32 %v3238_v35, %v569_v0  ;;  %v1421_v61 = vadd.f32 %v1275_v27, %v1227_v63  ;;  %v1240_v32 = vmul.f32 %v3238_v35, %v585_v1  ;;  %v2117_v21 = vld [vmem:[#allocation10 + $0x8] sm:$0xff]  ;;  %v555_v52 = vld [vmem:[#allocation13 + $0x10] sm:$0xff]  ;;  %v2127_v26 = vld [vmem:[#allocation10 + $0x20] sm:$0xff] }
 0x22a   : > { %1298 = vmatpush.msrb.mxu2 %v1229_v19  ;;  %1363 = vmatpush.msrb.mxu3 %v1277_v14  ;;  %v1225_v62 = vsub.f32 %v1193_v28, %v1209_v49  ;;  %v1273_v46 = vadd.f32 %v1257_v20, %v1241_v60  ;;  %v1420_v36 = vadd.f32 %v1274_v5, %v1226_v17  ;;  %v2123_v53 = vld [vmem:[#allocation10 + $0x10] sm:$0xff]  ;;  %v2124_v14 = vld [vmem:[#allocation10 + $0x38] sm:$0xff]  ;;  %v2126_v44 = vld [vmem:[#allocation10 + $0x28] sm:$0xff] }
 0x22b   : > { %1443 = vmatpush.msra.mxu0 %v1424_v25  ;;  %v1224_v29 = vsub.f32 %v1192_v45, %v1208_v31  ;;  %v1272_v42 = vadd.f32 %v1256_v15, %v1240_v32  ;;  %v3113_v19 = vld [vmem:[#allocation13 + $0x50] sm:$0xff]  ;;  %v2128_v41 = vld [vmem:[#allocation9 + $0x18] sm:$0xff]  ;;  %v562_v25 = vld [vmem:[#allocation13 + $0x48] sm:$0xff] }
 0x22c   : > { %1299 = vmatpush.msrb.mxu2 %v1228_v47  ;;  %1364 = vmatpush.msrb.mxu3 %v1276_v54  ;;  %v1419_v10 = vadd.f32 %v1273_v46, %v1225_v62  ;;  %v2125_v34 = vld [vmem:[#allocation10 + $0x30] sm:$0xff]  ;;  %v556_v37 = vld [vmem:[#allocation13 + $0x18] sm:$0xff]  ;;  %v2130_v47 = vld [vmem:[#allocation9 + $0x20] sm:$0xff] }
 0x22d   : > { %1444 = vmatpush.msra.mxu0 %v1423_v23  ;;  %v1418_v3 = vadd.f32 %v1272_v42, %v1224_v29  ;;  %v2129_v24 = vld [vmem:[#allocation10 + $0x18] sm:$0xff]  ;;  %v557_v54 = vld [vmem:[#allocation13 + $0x20] sm:$0xff]  ;;  %v559_v9 = vld [vmem:[#allocation13 + $0x30] sm:$0xff] }
 0x22e   : > { %1300 = vmatpush.msrb.mxu2 %v1227_v63  ;;  %1365 = vmatpush.msrb.mxu3 %v1275_v27  ;;  %v561_v16 = vld [vmem:[#allocation13 + $0x40] sm:$0xff]  ;;  %v560_v7 = vld [vmem:[#allocation13 + $0x38] sm:$0xff]  ;;  %v558_v2 = vld [vmem:[#allocation13 + $0x28] sm:$0xff] }
 0x22f   : > { %1445 = vmatpush.msra.mxu0 %v1422_v11  ;;  %v2131_v49 = vld [vmem:[#allocation9 + $0x28] sm:$0xff]  ;;  %v2132_v20 = vld [vmem:[#allocation9 + $0x30] sm:$0xff]  ;;  %v2133_v23 = vld [vmem:[#allocation9 + $0x38] sm:$0xff] }
 0x230   : > { %1301 = vmatpush.msrb.mxu2 %v1226_v17  ;;  %1366 = vmatpush.msrb.mxu3 %v1274_v5  ;;  %v2134_v63 = vld [vmem:[#allocation9 + $0x40] sm:$0xff]  ;;  %v2135_v27 = vld [vmem:[#allocation9 + $0x48] sm:$0xff]  ;;  %v2136_v51 = vld [vmem:[#allocation9 + $0x50] sm:$0xff] }
 0x231   : > { %1446 = vmatpush.msra.mxu0 %v1421_v61  ;;  %v2137_v0 = vld [vmem:[#allocation9 + $0x58] sm:$0xff]  ;;  %v2138_v1 = vld [vmem:[#allocation9 + $0x60] sm:$0xff]  ;;  %v2139_v28 = vld [vmem:[#allocation9 + $0x68] sm:$0xff] }
 0x232   : > { %1302 = vmatpush.msrb.mxu2 %v1225_v62  ;;  %1367 = vmatpush.msrb.mxu3 %v1273_v46  ;;  %v2140_v30 = vld [vmem:[#allocation9 + $0x70] sm:$0xff]  ;;  %v2141_v31 = vld [vmem:[#allocation9 + $0x78] sm:$0xff] }
 0x233   : > { %1447 = vmatpush.msra.mxu0 %v1420_v36 }
 0x234   : > { %1303 = vmatpush.msrb.mxu2 %v1224_v29  ;;  %1368 = vmatpush.msrb.mxu3 %v1272_v42 }
 0x235   : > { %1448 = vmatpush.msra.mxu0 %v1419_v10  ;;  %1304 = vmatmul.f32.vlgmr.msrb.gmra.mxu2 %v2110_v40 }
 0x236   : > { %1369 = vmatmul.f32.vlgmr.msrb.gmra.mxu3 %v2111_v55  ;;  %1598 = vmatpush.msra.mxu2 %v3075_v56 }
 0x237   : > { %1449 = vmatpush.msra.mxu0 %v1418_v3  ;;  %1665 = vmatpush.msra.mxu3 %v3071_v4 }
 0x238   : > { %1450 = vmatmul.f32.vlgmr.msra.gmra.mxu0 %v3073_v39  ;;  %1599 = vmatpush.msra.mxu2 %v3082_v58 }
 0x239   : > { %1666 = vmatpush.msra.mxu3 %v3078_v57 }
 0x23a   : > { %1600 = vmatpush.msra.mxu2 %v3088_v8 }
 0x23b   : > { %1667 = vmatpush.msra.mxu3 %v3085_v59 }
 0x23c   : > { %1601 = vmatpush.msra.mxu2 %v3092_v18 }
 0x23d   : > { %1307 = vmatmul.f32.gmra.mxu2 %v2116_v12  ;;  %1668 = vmatpush.msra.mxu3 %v3095_v48 }
 0x23e   : > { %1372 = vmatmul.f32.gmra.mxu3 %v2117_v21  ;;  %1602 = vmatpush.msra.mxu2 %v3100_v13 }
 0x23f   : > { %1669 = vmatpush.msra.mxu3 %v3103_v22 }
 0x240   : > { %1453 = vmatmul.f32.gmra.mxu0 %v3097_v6  ;;  %1603 = vmatpush.msra.mxu2 %v3107_v38 }
 0x241   : > { %1670 = vmatpush.msra.mxu3 %v3113_v19 }
 0x242   : > { %1604 = vmatpush.msra.mxu2 %v3110_v50 }
 0x243   : > { %1671 = vmatpush.msra.mxu3 %v562_v25 }
 0x244   : > { %1605 = vmatpush.msra.mxu2 %v2121_v43 }
 0x245   : > { %1310 = vmatmul.f32.gmra.mxu2 %v2122_v33  ;;  %1672 = vmatpush.msra.mxu3 %v561_v16 }
 0x246   : > { %1375 = vmatmul.f32.gmra.mxu3 %v2123_v53  ;;  %1606 = vmatpush.msra.mxu2 %v2124_v14 }
 0x247   : > { %1673 = vmatpush.msra.mxu3 %v560_v7 }
 0x248   : > { %1456 = vmatmul.f32.gmra.mxu0 %v555_v52  ;;  %1607 = vmatpush.msra.mxu2 %v2125_v34 }
 0x249   : > { %1674 = vmatpush.msra.mxu3 %v559_v9 }
 0x24a   : > { %1608 = vmatpush.msra.mxu2 %v2126_v44 }
 0x24b   : > { %1675 = vmatpush.msra.mxu3 %v558_v2 }
 0x24c   : > { %1609 = vmatpush.msra.mxu2 %v2127_v26 }
 0x24d   : > { %1313 = vmatmul.f32.gmra.mxu2 %v2128_v41  ;;  %1676 = vmatpush.msra.mxu3 %v557_v54 }
 0x24e   : > { %1378 = vmatmul.f32.gmra.mxu3 %v2129_v24  ;;  %1610 = vmatpush.msra.mxu2 %v2129_v24 }
 0x24f   : > { %1677 = vmatpush.msra.mxu3 %v556_v37 }
 0x250   : > { %1459 = vmatmul.f32.gmra.mxu0 %v556_v37  ;;  %1611 = vmatpush.msra.mxu2 %v2123_v53 }
 0x251   : > { %1678 = vmatpush.msra.mxu3 %v555_v52 }
 0x252   : > { %1612 = vmatpush.msra.mxu2 %v2117_v21 }
 0x253   : > { %1679 = vmatpush.msra.mxu3 %v3097_v6 }
 0x254   : > { %1613 = vmatpush.msra.mxu2 %v2111_v55 }
 0x255   : > { %1316 = vmatmul.f32.gmra.mxu2 %v2130_v47  ;;  %1680 = vmatpush.msra.mxu3 %v3073_v39 }
 0x256   : > { %1381 = vmatmul.f32.gmra.mxu3 %v2127_v26 }
 0x258   : > { %1462 = vmatmul.f32.gmra.mxu0 %v557_v54 }
 0x25d   : > { %1319 = vmatmul.f32.gmra.mxu2 %v2131_v49 }
 0x25e   : > { %1384 = vmatmul.f32.gmra.mxu3 %v2126_v44 }
 0x260   : > { %1465 = vmatmul.f32.gmra.mxu0 %v558_v2 }
 0x265   : > { %1322 = vmatmul.f32.gmra.mxu2 %v2132_v20 }
 0x266   : > { %1387 = vmatmul.f32.gmra.mxu3 %v2125_v34 }
 0x268   : > { %1468 = vmatmul.f32.gmra.mxu0 %v559_v9 }
 0x26d   : > { %1325 = vmatmul.f32.gmra.mxu2 %v2133_v23 }
 0x26e   : > { %1390 = vmatmul.f32.gmra.mxu3 %v2124_v14 }
 0x270   : > { %1471 = vmatmul.f32.gmra.mxu0 %v560_v7 }
 0x275   : > { %1328 = vmatmul.f32.gmra.mxu2 %v2134_v63 }
 0x276   : > { %1393 = vmatmul.f32.gmra.mxu3 %v2121_v43 }
 0x278   : > { %1474 = vmatmul.f32.gmra.mxu0 %v561_v16 }
 0x27d   : > { %1331 = vmatmul.f32.gmra.mxu2 %v2135_v27 }
 0x27e   : > { %1396 = vmatmul.f32.gmra.mxu3 %v3110_v50 }
 0x280   : > { %1477 = vmatmul.f32.gmra.mxu0 %v562_v25 }
 0x285   : > { %1334 = vmatmul.f32.gmra.mxu2 %v2136_v51 }
 0x286   : > { %1399 = vmatmul.f32.gmra.mxu3 %v3107_v38 }
 0x288   : > { %1480 = vmatmul.f32.gmra.mxu0 %v3113_v19 }
 0x28d   : > { %1337 = vmatmul.f32.gmra.mxu2 %v2137_v0 }
 0x28e   : > { %1402 = vmatmul.f32.gmra.mxu3 %v3100_v13 }
 0x290   : > { %1483 = vmatmul.f32.gmra.mxu0 %v3103_v22 }
 0x295   : > { %1340 = vmatmul.f32.gmra.mxu2 %v2138_v1 }
 0x296   : > { %1405 = vmatmul.f32.gmra.mxu3 %v3092_v18 }
 0x298   : > { %1486 = vmatmul.f32.gmra.mxu0 %v3095_v48 }
 0x29d   : > { %1343 = vmatmul.f32.gmra.mxu2 %v2139_v28 }
 0x29e   : > { %1408 = vmatmul.f32.gmra.mxu3 %v3088_v8 }
 0x2a0   : > { %1489 = vmatmul.f32.gmra.mxu0 %v3085_v59 }
 0x2a5   : > { %1346 = vmatmul.f32.gmra.mxu2 %v2140_v30 }
 0x2a6   : > { %1411 = vmatmul.f32.gmra.mxu3 %v3082_v58 }
 0x2a8   : > { %1492 = vmatmul.f32.gmra.mxu0 %v3078_v57 }
 0x2ad   : > { %1349 = vmatmul.f32.gmra.mxu2 %v2141_v31 }
 0x2ae   : > { %1414 = vmatmul.f32.gmra.mxu3 %v3075_v56 }
 0x2b0   : > { %1495 = vmatmul.f32.gmra.mxu0 %v3071_v4 }
 0x2b5   : > { %v1451_v15 = vpop.f32.mrf.mxu0 }
 0x2b8   : > { %v1305_v11 = vpop.f32.mrf.mxu2 }
 0x2b9   : > { %v1515_v17 = vsub.f32 %v1451_v15, %v1305_v11  ;;  %v1370_v5 = vpop.f32.mrf.mxu3 }
 0x2ba   : > { %v1499_v60 = vadd.f32 %v1370_v5, %v1305_v11 }
 0x2bb   : > { %v1531_v35 = vadd.f32 %v1515_v17, %v1370_v5 }
 0x2bc   : > { %1563 = vmatmul.f32.vlgmr.msra.gmra.mxu1 %v1499_v60 }
 0x2bd   : > { %v1649_v45 = vadd.f32 %v1531_v35, %v1499_v60  ;;  %1614 = vmatmul.f32.vlgmr.msra.gmra.mxu2 %v1531_v35  ;;  %v1454_v61 = vpop.f32.mrf.mxu0 }
 0x2bf   : > { %1681 = vmatmul.f32.vlgmr.msra.gmra.mxu3 %v1649_v45 }
 0x2c0   : > { %v1308_v62 = vpop.f32.mrf.mxu2 }
 0x2c1   : > { %v1516_v46 = vsub.f32 %v1454_v61, %v1308_v62  ;;  %v1373_v32 = vpop.f32.mrf.mxu3 }
 0x2c2   : > { %v1500_v36 = vadd.f32 %v1373_v32, %v1308_v62 }
 0x2c3   : > { %v1532_v29 = vadd.f32 %v1516_v46, %v1373_v32 }
 0x2c4   : > { %1566 = vmatmul.f32.gmra.mxu1 %v1500_v36 }
 0x2c5   : > { %1617 = vmatmul.f32.gmra.mxu2 %v1532_v29  ;;  %v1650_v42 = vadd.f32 %v1532_v29, %v1500_v36  ;;  %v1457_v10 = vpop.f32.mrf.mxu0 }
 0x2c7   : > { %1684 = vmatmul.f32.gmra.mxu3 %v1650_v42 }
 0x2c8   : > { %v1311_v4 = vpop.f32.mrf.mxu2 }
 0x2c9   : > { %v1517_v3 = vsub.f32 %v1457_v10, %v1311_v4  ;;  %v1376_v40 = vpop.f32.mrf.mxu3 }
 0x2ca   : > { %v1501_v39 = vadd.f32 %v1376_v40, %v1311_v4 }
 0x2cb   : > { %v1533_v55 = vadd.f32 %v1517_v3, %v1376_v40 }
 0x2cc   : > { %1569 = vmatmul.f32.gmra.mxu1 %v1501_v39 }
 0x2cd   : > { %1620 = vmatmul.f32.gmra.mxu2 %v1533_v55  ;;  %v1651_v56 = vadd.f32 %v1533_v55, %v1501_v39  ;;  %v1460_v57 = vpop.f32.mrf.mxu0 }
 0x2cf   : > { %1687 = vmatmul.f32.gmra.mxu3 %v1651_v56 }
 0x2d0   : > { %v1314_v58 = vpop.f32.mrf.mxu2 }
 0x2d1   : > { %v1518_v59 = vsub.f32 %v1460_v57, %v1314_v58  ;;  %v1379_v8 = vpop.f32.mrf.mxu3 }
 0x2d2   : > { %v1502_v18 = vadd.f32 %v1379_v8, %v1314_v58 }
 0x2d3   : > { %v1534_v48 = vadd.f32 %v1518_v59, %v1379_v8 }
 0x2d4   : > { %1571 = vmatmul.f32.gmra.mxu1 %v1502_v18 }
 0x2d5   : > { %1622 = vmatmul.f32.gmra.mxu2 %v1534_v48  ;;  %v1652_v12 = vadd.f32 %v1534_v48, %v1502_v18  ;;  %v1463_v6 = vpop.f32.mrf.mxu0 }
 0x2d7   : > { %1689 = vmatmul.f32.gmra.mxu3 %v1652_v12 }
 0x2d8   : > { %v1317_v21 = vpop.f32.mrf.mxu2 }
 0x2d9   : > { %v1519_v13 = vsub.f32 %v1463_v6, %v1317_v21  ;;  %v1382_v22 = vpop.f32.mrf.mxu3 }
 0x2da   : > { %v1503_v38 = vadd.f32 %v1382_v22, %v1317_v21 }
 0x2db   : > { %v1535_v50 = vadd.f32 %v1519_v13, %v1382_v22 }
 0x2dc   : > { %1573 = vmatmul.f32.gmra.mxu1 %v1503_v38 }
 0x2dd   : > { %1624 = vmatmul.f32.gmra.mxu2 %v1535_v50  ;;  %v1653_v43 = vadd.f32 %v1535_v50, %v1503_v38  ;;  %v1466_v33 = vpop.f32.mrf.mxu0 }
 0x2df   : > { %1691 = vmatmul.f32.gmra.mxu3 %v1653_v43 }
 0x2e0   : > { %v1320_v52 = vpop.f32.mrf.mxu2 }
 0x2e1   : > { %v1520_v53 = vsub.f32 %v1466_v33, %v1320_v52  ;;  %v1385_v19 = vpop.f32.mrf.mxu3 }
 0x2e2   : > { %v1504_v14 = vadd.f32 %v1385_v19, %v1320_v52 }
 0x2e3   : > { %v1536_v34 = vadd.f32 %v1520_v53, %v1385_v19 }
 0x2e4   : > { %1575 = vmatmul.f32.gmra.mxu1 %v1504_v14 }
 0x2e5   : > { %1626 = vmatmul.f32.gmra.mxu2 %v1536_v34  ;;  %v1654_v44 = vadd.f32 %v1536_v34, %v1504_v14  ;;  %v1469_v26 = vpop.f32.mrf.mxu0 }
 0x2e7   : > { %1693 = vmatmul.f32.gmra.mxu3 %v1654_v44 }
 0x2e8   : > { %v1323_v41 = vpop.f32.mrf.mxu2 }
 0x2e9   : > { %v1521_v37 = vsub.f32 %v1469_v26, %v1323_v41  ;;  %v1388_v24 = vpop.f32.mrf.mxu3 }
 0x2ea   : > { %v1505_v25 = vadd.f32 %v1388_v24, %v1323_v41 }
 0x2eb   : > { %v1537_v47 = vadd.f32 %v1521_v37, %v1388_v24 }
 0x2ec   : > { %1577 = vmatmul.f32.gmra.mxu1 %v1505_v25 }
 0x2ed   : > { %1628 = vmatmul.f32.gmra.mxu2 %v1537_v47  ;;  %v1655_v54 = vadd.f32 %v1537_v47, %v1505_v25  ;;  %v1472_v16 = vpop.f32.mrf.mxu0 }
 0x2ef   : > { %1695 = vmatmul.f32.gmra.mxu3 %v1655_v54 }
 0x2f0   : > { %v1326_v7 = vpop.f32.mrf.mxu2 }
 0x2f1   : > { %v1522_v9 = vsub.f32 %v1472_v16, %v1326_v7  ;;  %v1391_v2 = vpop.f32.mrf.mxu3 }
 0x2f2   : > { %v1506_v49 = vadd.f32 %v1391_v2, %v1326_v7 }
 0x2f3   : > { %v1538_v20 = vadd.f32 %v1522_v9, %v1391_v2 }
 0x2f4   : > { %1579 = vmatmul.f32.gmra.mxu1 %v1506_v49 }
 0x2f5   : > { %1630 = vmatmul.f32.gmra.mxu2 %v1538_v20  ;;  %v1656_v23 = vadd.f32 %v1538_v20, %v1506_v49  ;;  %v1475_v63 = vpop.f32.mrf.mxu0 }
 0x2f7   : > { %1697 = vmatmul.f32.gmra.mxu3 %v1656_v23 }
 0x2f8   : > { %v1329_v27 = vpop.f32.mrf.mxu2 }
 0x2f9   : > { %v1523_v51 = vsub.f32 %v1475_v63, %v1329_v27  ;;  %v1394_v0 = vpop.f32.mrf.mxu3 }
 0x2fa   : > { %v1507_v1 = vadd.f32 %v1394_v0, %v1329_v27 }
 0x2fb   : > { %v1539_v28 = vadd.f32 %v1523_v51, %v1394_v0 }
 0x2fc   : > { %1581 = vmatmul.f32.gmra.mxu1 %v1507_v1 }
 0x2fd   : > { %v1657_v30 = vadd.f32 %v1539_v28, %v1507_v1  ;;  %1632 = vmatmul.f32.gmra.mxu2 %v1539_v28  ;;  %v1478_v31 = vpop.f32.mrf.mxu0 }
 0x2ff   : > { %1699 = vmatmul.f32.gmra.mxu3 %v1657_v30 }
 0x300   : > { %v1332_v15 = vpop.f32.mrf.mxu2 }
 0x301   : > { %v1524_v11 = vsub.f32 %v1478_v31, %v1332_v15  ;;  %v1397_v17 = vpop.f32.mrf.mxu3 }
 0x302   : > { %v1508_v5 = vadd.f32 %v1397_v17, %v1332_v15 }
 0x303   : > { %v1540_v60 = vadd.f32 %v1524_v11, %v1397_v17 }
 0x304   : > { %1583 = vmatmul.f32.gmra.mxu1 %v1508_v5 }
 0x305   : > { %v1658_v35 = vadd.f32 %v1540_v60, %v1508_v5  ;;  %1634 = vmatmul.f32.gmra.mxu2 %v1540_v60  ;;  %v1481_v45 = vpop.f32.mrf.mxu0 }
 0x307   : > { %1701 = vmatmul.f32.gmra.mxu3 %v1658_v35 }
 0x308   : > { %v1335_v61 = vpop.f32.mrf.mxu2 }
 0x309   : > { %v1525_v62 = vsub.f32 %v1481_v45, %v1335_v61  ;;  %v1400_v46 = vpop.f32.mrf.mxu3 }
 0x30a   : > { %v1509_v32 = vadd.f32 %v1400_v46, %v1335_v61 }
 0x30b   : > { %v1541_v36 = vadd.f32 %v1525_v62, %v1400_v46 }
 0x30c   : > { %1585 = vmatmul.f32.gmra.mxu1 %v1509_v32 }
 0x30d   : > { %v1659_v29 = vadd.f32 %v1541_v36, %v1509_v32  ;;  %1636 = vmatmul.f32.gmra.mxu2 %v1541_v36  ;;  %v1484_v42 = vpop.f32.mrf.mxu0 }
 0x30f   : > { %1703 = vmatmul.f32.gmra.mxu3 %v1659_v29 }
 0x310   : > { %v1338_v10 = vpop.f32.mrf.mxu2 }
 0x311   : > { %v1526_v4 = vsub.f32 %v1484_v42, %v1338_v10  ;;  %v1403_v3 = vpop.f32.mrf.mxu3 }
 0x312   : > { %v1510_v40 = vadd.f32 %v1403_v3, %v1338_v10 }
 0x313   : > { %v1542_v39 = vadd.f32 %v1526_v4, %v1403_v3 }
 0x314   : > { %1587 = vmatmul.f32.gmra.mxu1 %v1510_v40 }
 0x315   : > { %v1660_v55 = vadd.f32 %v1542_v39, %v1510_v40  ;;  %1638 = vmatmul.f32.gmra.mxu2 %v1542_v39  ;;  %v1487_v56 = vpop.f32.mrf.mxu0 }
 0x317   : > { %1705 = vmatmul.f32.gmra.mxu3 %v1660_v55 }
 0x318   : > { %v1341_v57 = vpop.f32.mrf.mxu2 }
 0x319   : > { %v1527_v58 = vsub.f32 %v1487_v56, %v1341_v57  ;;  %v1406_v59 = vpop.f32.mrf.mxu3 }
 0x31a   : > { %v1511_v8 = vadd.f32 %v1406_v59, %v1341_v57 }
 0x31b   : > { %v1543_v18 = vadd.f32 %v1527_v58, %v1406_v59 }
 0x31c   : > { %1589 = vmatmul.f32.gmra.mxu1 %v1511_v8 }
 0x31d   : > { %v1661_v48 = vadd.f32 %v1543_v18, %v1511_v8  ;;  %1640 = vmatmul.f32.gmra.mxu2 %v1543_v18  ;;  %v1490_v12 = vpop.f32.mrf.mxu0 }
 0x31f   : > { %1707 = vmatmul.f32.gmra.mxu3 %v1661_v48 }
 0x320   : > { %v1344_v6 = vpop.f32.mrf.mxu2 }
 0x321   : > { %v1528_v21 = vsub.f32 %v1490_v12, %v1344_v6  ;;  %v1409_v13 = vpop.f32.mrf.mxu3 }
 0x322   : > { %v1512_v22 = vadd.f32 %v1409_v13, %v1344_v6 }
 0x323   : > { %v1544_v38 = vadd.f32 %v1528_v21, %v1409_v13 }
 0x324   : > { %1591 = vmatmul.f32.gmra.mxu1 %v1512_v22 }
 0x325   : > { %v1662_v50 = vadd.f32 %v1544_v38, %v1512_v22  ;;  %1642 = vmatmul.f32.gmra.mxu2 %v1544_v38  ;;  %v1493_v43 = vpop.f32.mrf.mxu0 }
 0x327   : > { %1709 = vmatmul.f32.gmra.mxu3 %v1662_v50 }
 0x328   : > { %v1347_v33 = vpop.f32.mrf.mxu2 }
 0x329   : > { %v1529_v52 = vsub.f32 %v1493_v43, %v1347_v33  ;;  %v1412_v53 = vpop.f32.mrf.mxu3 }
 0x32a   : > { %v1513_v19 = vadd.f32 %v1412_v53, %v1347_v33 }
 0x32b   : > { %v1545_v14 = vadd.f32 %v1529_v52, %v1412_v53 }
 0x32c   : > { %1593 = vmatmul.f32.gmra.mxu1 %v1513_v19 }
 0x32d   : > { %v1663_v34 = vadd.f32 %v1545_v14, %v1513_v19  ;;  %1644 = vmatmul.f32.gmra.mxu2 %v1545_v14  ;;  %v1496_v44 = vpop.f32.mrf.mxu0 }
 0x32f   : > { %1711 = vmatmul.f32.gmra.mxu3 %v1663_v34 }
 0x330   : > { %v1350_v26 = vpop.f32.mrf.mxu2 }
 0x331   : > { %v1530_v41 = vsub.f32 %v1496_v44, %v1350_v26  ;;  %v1415_v37 = vpop.f32.mrf.mxu3 }
 0x332   : > { %v1514_v24 = vadd.f32 %v1415_v37, %v1350_v26 }
 0x333   : > { %v1546_v25 = vadd.f32 %v1530_v41, %v1415_v37 }
 0x334   : > { %1595 = vmatmul.f32.gmra.mxu1 %v1514_v24 }
 0x335   : > { %v1664_v47 = vadd.f32 %v1546_v25, %v1514_v24  ;;  %1646 = vmatmul.f32.gmra.mxu2 %v1546_v25 }
 0x337   : > { %1713 = vmatmul.f32.gmra.mxu3 %v1664_v47 }
 0x339   : > { %v1564_v54 = vpop.f32.mrf.mxu1 }
 0x340   : > { %v1615_v16 = vpop.f32.mrf.mxu2 }
 0x341   : > { %v1716_v7 = vadd.f32 %v1615_v16, %v1564_v54  ;;  %v1567_v9 = vpop.f32.mrf.mxu1 }
 0x342   : > { %v1682_v2 = vpop.f32.mrf.mxu3 }
 0x343   : > { %1722 = vst.msk [vmem:[%s497_s20] sm:$0xff] %vm635_vm0, %v1716_v7  ;;  %v1718_v49 = vsub.f32 %v1682_v2, %v1564_v54 }
 0x345   : > { %v1720_v20 = vadd.f32 %v1718_v49, %v1615_v16 }
 0x347   : > { %1724 = vst.msk [vmem:[%s3138_s3] sm:$0xff] %vm635_vm0, %v1720_v20 }
 0x348   : > { %v1618_v23 = vpop.f32.mrf.mxu2 }
 0x349   : > { %v1717_v63 = vadd.f32 %v1618_v23, %v1567_v9  ;;  %v1570_v27 = vpop.f32.mrf.mxu1 }
 0x34a   : > { %v1685_v51 = vpop.f32.mrf.mxu3 }
 0x34b   : > { %1723 = vst.msk [vmem:[%s497_s20 + $0x8] sm:$0xff] %vm635_vm0, %v1717_v63  ;;  %v1719_v0 = vsub.f32 %v1685_v51, %v1567_v9 }
 0x34c   : > { %2409 = shalt.err (!%p2406_p5)
}
 0x34d   : > { %s2511_s15 = smov 128   ;;  %s2512_s5 = smov 8   ;;  %v1721_v1 = vadd.f32 %v1719_v0, %v1618_v23 }
 0x34e   : > { %2016 = dma.vmem_to_hbm [thread:$0]  (%p2678_p4), %s1745_s29, 256, %s1747_s23, %s1727_s7, %s2511_s15, %s2511_s15, %s2512_s5  }
 0x34f   : > { %1725 = vst.msk [vmem:[%s3138_s3 + $0x8] sm:$0xff] %vm635_vm0, %v1721_v1  ;;  %s1732_s26 = scalar_lea.sflag [#allocation20], %s2737_s13  ;;  %s2424_s20 = sshra.s32 %s1764_s4, 4  ;;  %s2425_s20 = int_to_ptr.hbm [resolvable:$true] %s2424_s20 }
 0x350   : > { %v1621_v28 = vpop.f32.mrf.mxu2  ;;  %s2426_s16 = scalar_lea.hbm %s2425_s20, 16  ;;  %s2430_s27 = scalar_lea.hbm %s3201_s9, 32 }
 0x351   : > { %p2427_p10 = scmp.ne.s32.totalorder %s2425_s20, %s2426_s16  ;;  %p2431_p0 = scmp.lt.s32.totalorder %s2425_s20, %s3201_s9 }
 0x352   : > { %p2432_p2 = scmp.lt.s32.totalorder %s2430_s27, %s2426_s16 }
 0x353   : > { %p2428_p11 = pnand %p2427_p10, %p2678_p4 }
 0x354   : > { %p2433_p1 = por %p2432_p2, %p2431_p0 }
 0x355   : > { %p2429_p13 = pneg %p2428_p11 }
 0x357   : > { %p2434_p3 = pnand %p2433_p1, %p2429_p13 }
 0x359   : > { %2437 = shalt.err (!%p2434_p3)
}
 0x35a   : > { %2017 = dma.vmem_to_hbm [thread:$0]  (%p2678_p4), %s1762_s22, 256, %s1764_s4, %s1732_s26, %s2511_s15, %s2511_s15, %s2512_s5   ;;  %v1572_v30 = vpop.f32.mrf.mxu1  ;;  %v1688_v31 = vpop.f32.mrf.mxu3 }
 0x35b   : > { %v1623_v15 = vpop.f32.mrf.mxu2 }
 0x362   : > { %v1574_v11 = vpop.f32.mrf.mxu1  ;;  %v1690_v17 = vpop.f32.mrf.mxu3 }
 0x363   : > { %v1625_v5 = vpop.f32.mrf.mxu2 }
 0x36a   : > { %v1576_v60 = vpop.f32.mrf.mxu1  ;;  %v1692_v35 = vpop.f32.mrf.mxu3 }
 0x36b   : > { %v1627_v45 = vpop.f32.mrf.mxu2 }
 0x372   : > { %v1578_v61 = vpop.f32.mrf.mxu1  ;;  %v1694_v62 = vpop.f32.mrf.mxu3 }
 0x373   : > { %v1629_v46 = vpop.f32.mrf.mxu2 }
 0x37a   : > { %v1580_v32 = vpop.f32.mrf.mxu1  ;;  %v1696_v36 = vpop.f32.mrf.mxu3 }
 0x37b   : > { %v1631_v29 = vpop.f32.mrf.mxu2 }
 0x382   : > { %v1582_v42 = vpop.f32.mrf.mxu1  ;;  %v1698_v10 = vpop.f32.mrf.mxu3 }
 0x383   : > { %v1633_v4 = vpop.f32.mrf.mxu2 }
 0x38a   : > { %v1584_v3 = vpop.f32.mrf.mxu1  ;;  %v1700_v40 = vpop.f32.mrf.mxu3 }
 0x38b   : > { %v1635_v39 = vpop.f32.mrf.mxu2 }
 0x392   : > { %v1586_v55 = vpop.f32.mrf.mxu1  ;;  %v1702_v56 = vpop.f32.mrf.mxu3 }
 0x393   : > { %v1637_v57 = vpop.f32.mrf.mxu2 }
 0x39a   : > { %v1588_v58 = vpop.f32.mrf.mxu1  ;;  %v1704_v59 = vpop.f32.mrf.mxu3 }
 0x39b   : > { %v1639_v8 = vpop.f32.mrf.mxu2 }
 0x3a2   : > { %v1590_v18 = vpop.f32.mrf.mxu1  ;;  %v1706_v48 = vpop.f32.mrf.mxu3 }
 0x3a3   : > { %v1641_v12 = vpop.f32.mrf.mxu2 }
 0x3aa   : > { %v1592_v6 = vpop.f32.mrf.mxu1  ;;  %v1708_v21 = vpop.f32.mrf.mxu3 }
 0x3ab   : > { %v1643_v13 = vpop.f32.mrf.mxu2 }
 0x3b2   : > { %v1594_v22 = vpop.f32.mrf.mxu1  ;;  %v1710_v38 = vpop.f32.mrf.mxu3 }
 0x3b3   : > { %v1645_v50 = vpop.f32.mrf.mxu2 }
 0x3ba   : > { %v1596_v43 = vpop.f32.mrf.mxu1  ;;  %v1712_v33 = vpop.f32.mrf.mxu3 }
 0x3bb   : > { %v1647_v52 = vpop.f32.mrf.mxu2 }
 0x3c2   : > { %v1714_v53 = vpop.f32.mrf.mxu3 }
 0x3c3 PF: > { %s1778_s14 = sand.u32 1, %s2488_s30   ;;  %p3239_p4 = scmp.ge.s32.totalorder %s2500_s12, 2 }
 0x3c4   : > { %s1779_s13 = scalar_lea.sflag [#allocation6], %s1778_s14 }
 0x3c5   : > { %p2047_p12 = pnand %p3239_p4, %p2682_p6 }
 0x3c7   : > { %p2048_p7 = pneg %p2047_p12 }
 0x3c9   : > { %2479 = dma.done.wait (%p2048_p7), %s1779_s13, 256  }
 0x3ca   : > { %2481 = vsyncadd (%p2048_p7), %s1779_s13, 4294967040  ;;  %s1789_s23 = scalar_lea.sflag [#allocation20], %s1778_s14 }
 0x3cb   : > { %2483 = dma.done.wait (%p2048_p7), %s1789_s23, 256  }
 0x3cc   : > { %2485 = vsyncadd (%p2048_p7), %s1789_s23, 4294967040  ;;  %s3240_s3 = sld [smem:[#allocation29_spill]]  ;;  %p32_p9 = scmp.ge.s32.totalorder %s2652_s19, 4  }
 0x3cd   : > { %s3241_s30 = smov %s2492_s10  ;;  %s3242_s10 = smov %s2496_s11 }
 0x3ce   : > { %s3244_s12 = smov %s2652_s19  ;;  %34 = sbr.rel (!%p32_p9) target bundleno = 20 (0x14), region = 151 }
 0x3d2   : > { %s3243_s11 = smov %s3240_s3 }
 0x3d3   :  { %1795 = vsyncpa [#allocation5], 1 }
 0x3d4   :  { %1797 = vsyncpa [#allocation5 + $0x1], 1 }
 0x3d5   :  { %1798 = vsyncpa [#allocation8], 1 }
 0x3d6   :  { %1800 = vsyncpa [#allocation8 + $0x1], 1 }
 0x3d7   :  { %1801 = vsyncpa [#allocation11], 1 }
 0x3d8   :  { %1802 = vsyncpa [#allocation14], 1 }
 0x3d9   :  { %1803 = vsyncpa [#allocation17], 1 }
 0x3da   :  { %1804 = vsyncpa [#allocation6], 1 }
 0x3db   :  { %1806 = vsyncpa [#allocation6 + $0x1], 1 }
 0x3dc   :  { %1807 = vsyncpa [#allocation20], 1 }
 0x3dd   :  { %1809 = vsyncpa [#allocation20 + $0x1], 1 }

</bundles_post_ra>
